<compile_context>
chip_gen: v7x
topology: tpu7x:2x2x1
jax: 0.10.0
libtpu: 0.0.40
codegen_flags: <defaults>
</compile_context>

<pallas_src>
import jax
import jax.numpy as jnp
from jax.experimental import pallas as pl
from jax.experimental.pallas import tpu as pltpu


# ---------------------------- Pallas kernels ----------------------------

def _win_attn_kernel(x_ref, wq_ref, wk_ref, wv_ref, bq_ref, bv_ref,
                     hsum_ref, hexps_ref, hexp_ref, pmask_ref, bias_ref,
                     mexp_ref, lsum_ref, wp_ref, bp_ref, o_ref):
    """Fused Swin-V2 window cosine attention for a block of Bb windows.

    Shapes (P = H*N):
      x:(Bb,N,C)  wq/wk/wv/wproj:(C,C) in compute dtype  bq/bv/bproj:(1,C)
      hsum:(C,H)  hexp/hexps:(H,C)  pmask:(P,C)  bias:(N,P)  mexp:(H,P)
      lsum:(P,H)  out:(Bb,N,C)
    """
    Bb, N, C = x_ref.shape
    H = hsum_ref.shape[1]
    P = H * N
    M = Bb * N
    cdt = wq_ref.dtype                 # MXU operand dtype (f32, or bf16 on v6e/v7x)

    x2 = x_ref[...].reshape(M, C).astype(cdt)

    # qkv projections on the merged M = Bb*N rows (k has no bias in Swin-V2).
    q = jnp.dot(x2, wq_ref[...], preferred_element_type=jnp.float32) + bq_ref[...]
    k = jnp.dot(x2, wk_ref[...], preferred_element_type=jnp.float32)
    v = jnp.dot(x2, wv_ref[...], preferred_element_type=jnp.float32) + bv_ref[...]

    # Per-head L2 normalisation via tiny block-ones matmuls (no (., hd) slices).
    # ss[m,h] = sum_{c in head h} q[m,c]^2 ; rsqrt goes to the EUP.
    hsum = hsum_ref[...]
    inv_q = jax.lax.rsqrt(jnp.maximum(
        jnp.dot(q * q, hsum, preferred_element_type=jnp.float32), 1e-24))
    inv_k = jax.lax.rsqrt(jnp.maximum(
        jnp.dot(k * k, hsum, preferred_element_type=jnp.float32), 1e-24))
    # hexps folds the per-head logit scale into q:  s*(q @ k^T) == (s*q) @ k^T.
    qn = q * jnp.dot(inv_q, hexps_ref[...], preferred_element_type=jnp.float32)
    kn = k * jnp.dot(inv_k, hexp_ref[...], preferred_element_type=jnp.float32)

    # All-head scores in ONE matmul: pack K block-diagonally along rows so the
    # score tensor is lane-dense (last dim P = H*N) and the contraction K = C.
    pmask = pmask_ref[...]
    kn3 = kn.reshape(Bb, N, C)
    kpack = (jnp.concatenate([kn3] * H, axis=1) * pmask).astype(cdt)   # (Bb,P,C)
    s = jnp.einsum('bqc,bpc->bqp', qn.reshape(Bb, N, C).astype(cdt), kpack,
                   preferred_element_type=jnp.float32)                 # (Bb,N,P)
    s = (s + bias_ref[...]).reshape(M, P)

    # Softmax per head block.  Exact per-head max subtraction is kept: scale can
    # reach 100 and bias 16, so exp could overflow f32 without it.
    m_h = jnp.concatenate(
        [jnp.max(s[:, h * N:(h + 1) * N], axis=-1, keepdims=True)
         for h in range(H)], axis=-1)                                  # (M, H)
    p = jnp.exp(s - jnp.dot(m_h, mexp_ref[...],
                            preferred_element_type=jnp.float32))       # (M, P)
    l = jnp.dot(p, lsum_ref[...], preferred_element_type=jnp.float32)  # (M, H) >= 1
    inv_l = pl.reciprocal(l, approx=False)

    # attn @ v for all heads in ONE matmul with the same block packing; head
    # outputs land in their own column blocks, so no concat / head transpose.
    v3 = v.reshape(Bb, N, C)
    vpack = (jnp.concatenate([v3] * H, axis=1) * pmask).astype(cdt)    # (Bb,P,C)
    ou = jnp.einsum('bqp,bpc->bqc', p.reshape(Bb, N, P).astype(cdt), vpack,
                    preferred_element_type=jnp.float32)                # (Bb,N,C)
    ou = ou.reshape(M, C) * jnp.dot(inv_l, hexp_ref[...],
                                    preferred_element_type=jnp.float32)

    # Output projection.
    y = jnp.dot(ou.astype(cdt), wp_ref[...],
                preferred_element_type=jnp.float32) + bp_ref[...]
    o_ref[...] = y.reshape(Bb, N, C).astype(o_ref.dtype)


def _cpb_mlp_kernel(ct_ref, w1_ref, b1_ref, w2_ref, o_ref):
    """Continuous position bias MLP: 16*sigmoid(ReLU(ct@W1 + b1) @ W2)."""
    h = jnp.dot(ct_ref[...], w1_ref[...],
                preferred_element_type=jnp.float32) + b1_ref[...]
    h = jnp.maximum(h, 0.0)
    o_ref[...] = 16.0 * jax.nn.sigmoid(
        jnp.dot(h, w2_ref[...], preferred_element_type=jnp.float32))


# ---------------------------- wrappers ----------------------------

def cpb_mlp_table(coords, cpb_w1, cpb_b1, cpb_w2):
    """coords:(T,2)  cpb_w1:(512,2)  cpb_b1:(512,)  cpb_w2:(H,512) -> (T,H)."""
    T = coords.shape[0]
    Hid = cpb_w1.shape[0]
    H = cpb_w2.shape[0]
    coords_p = jnp.pad(coords, ((0, 0), (0, 6)))                    # K: 2 -> 8
    w1p = jnp.zeros((8, Hid), jnp.float32).at[:2, :].set(cpb_w1.T)
    return pl.pallas_call(
        _cpb_mlp_kernel,
        out_shape=jax.ShapeDtypeStruct((T, H), jnp.float32),
    )(coords_p, w1p, cpb_b1.reshape(1, Hid), cpb_w2.T)


def prepare_window_attention(params, window_size, num_heads,
                             compute_dtype=jnp.float32):
    """One-time, parameter-only precompute (hoisted out of the per-call path)."""
    Wh, Ww = window_size
    N = Wh * Ww
    C = params["w_proj"].shape[0]
    hd = C // num_heads
    H = num_heads

    # Relative position bias: CPB MLP (Pallas) -> gather -> pack lane-dense.
    coords = make_relative_coords_table(window_size)                # (T, 2)
    rel_index = make_relative_position_index(window_size)           # (N, N)
    table = cpb_mlp_table(coords, params["cpb_w1"], params["cpb_b1"],
                          params["cpb_w2"])                         # (T, H), 16*sigmoid applied
    rel_bias = jnp.take(table, rel_index.reshape(-1), axis=0).reshape(N, N, H)
    bias_packed = jnp.transpose(rel_bias, (0, 2, 1)).reshape(N, H * N)  # (N, H*N)

    # Per-head logit scale exp(clamp(., log(1/0.01))) folded into a (H, C) map.
    scale = jnp.exp(jnp.minimum(params["logit_scale"].reshape(H),
                                jnp.log(1.0 / 0.01))).astype(jnp.float32)

    head_of_c = jnp.arange(C) // hd
    hexp = (jnp.arange(H)[:, None] == head_of_c[None, :]).astype(jnp.float32)  # (H, C)
    hsum = hexp.T                                                    # (C, H)
    hexps = hexp * scale[:, None]                                    # (H, C)
    pmask = jnp.repeat(hexp, N, axis=0)                              # (H*N, C)
    mexp = jnp.repeat(jnp.eye(H, dtype=jnp.float32), N, axis=1)      # (H, H*N)
    lsum = mexp.T                                                    # (H*N, H)

    wqkv_io = params["w_qkv"].T.astype(compute_dtype)                # (C, 3C)
    return dict(
        wq=wqkv_io[:, :C], wk=wqkv_io[:, C:2 * C], wv=wqkv_io[:, 2 * C:],
        bq=params["q_bias"].reshape(1, C).astype(jnp.float32),
        bv=params["v_bias"].reshape(1, C).astype(jnp.float32),
        hsum=hsum, hexps=hexps, hexp=hexp, pmask=pmask,
        bias=bias_packed, mexp=mexp, lsum=lsum,
        wproj=params["w_proj"].T.astype(compute_dtype),
        bproj=params["b_proj"].reshape(1, C).astype(jnp.float32),
    )


def _pick_block_windows(B_):
    # Batch windows per grid step (amortize ~0.35us/step, bigger DMAs, M>=128)
    # but keep >= 2 grid steps so v7x's two TensorCores both get work.
    target = max(1, min(8, B_ // 2))
    for bb in range(target, 0, -1):
        if B_ % bb == 0:
            return bb
    return 1


def window_attention_forward(x, prep, window_size, num_heads, block_windows=None):
    """x: (B_, N, C) with N = window_size[0]*window_size[1]."""
    B_, N, C = x.shape
    assert N == window_size[0] * window_size[1] and C % num_heads == 0

    Bb = block_windows if block_windows is not None else _pick_block_windows(B_)
    assert B_ % Bb == 0

    def const(a):
        shp = a.shape
        return pl.BlockSpec(shp, lambda b, _s=shp: (0,) * len(_s))

    return pl.pallas_call(
        _win_attn_kernel,
        out_shape=jax.ShapeDtypeStruct((B_, N, C), x.dtype),
        grid=(B_ // Bb,),
        in_specs=[
            pl.BlockSpec((Bb, N, C), lambda b: (b, 0, 0)),
            const(prep["wq"]), const(prep["wk"]), const(prep["wv"]),
            const(prep["bq"]), const(prep["bv"]),
            const(prep["hsum"]), const(prep["hexps"]), const(prep["hexp"]),
            const(prep["pmask"]), const(prep["bias"]),
            const(prep["mexp"]), const(prep["lsum"]),
            const(prep["wproj"]), const(prep["bproj"]),
        ],
        out_specs=pl.BlockSpec((Bb, N, C), lambda b: (b, 0, 0)),
        compiler_params=pltpu.CompilerParams(
            dimension_semantics=("parallel",),
            vmem_limit_bytes=32 * 1024 * 1024),
    )(x, prep["wq"], prep["wk"], prep["wv"], prep["bq"], prep["bv"],
      prep["hsum"], prep["hexps"], prep["hexp"], prep["pmask"], prep["bias"],
      prep["mexp"], prep["lsum"], prep["wproj"], prep["bproj"])


# ---------------------------- static buffers (match PyTorch) ----------------------------

def make_relative_coords_table(window_size, pretrained_window_size=(0, 0)):
    Wh, Ww = window_size
    rch = jnp.arange(-(Wh - 1), Wh, dtype=jnp.float32)
    rcw = jnp.arange(-(Ww - 1), Ww, dtype=jnp.float32)
    gh, gw = jnp.meshgrid(rch, rcw, indexing="ij")
    table = jnp.stack([gh, gw], axis=-1)                            # (2Wh-1, 2Ww-1, 2)
    if pretrained_window_size[0] > 0:
        denom = jnp.array([pretrained_window_size[0] - 1,
                           pretrained_window_size[1] - 1], jnp.float32)
    else:
        denom = jnp.array([Wh - 1, Ww - 1], jnp.float32)
    table = (table / denom) * 8.0
    table = jnp.sign(table) * jnp.log2(jnp.abs(table) + 1.0) / 3.0   # / log2(8)
    return table.reshape(-1, 2)                                      # (T, 2)


def make_relative_position_index(window_size):
    Wh, Ww = window_size
    gh, gw = jnp.meshgrid(jnp.arange(Wh), jnp.arange(Ww), indexing="ij")
    coords = jnp.stack([gh, gw]).reshape(2, -1)                      # (2, N)
    rel = coords[:, :, None] - coords[:, None, :]                    # (2, N, N)
    rel = jnp.transpose(rel, (1, 2, 0))                              # (N, N, 2)
    rel = rel.at[:, :, 0].add(Wh - 1)
    rel = rel.at[:, :, 1].add(Ww - 1)
    rel = rel.at[:, :, 0].multiply(2 * Ww - 1)
    return rel.sum(-1).astype(jnp.int32)                             # (N, N)


# ---------------------------- parameter setup ----------------------------

def init_window_attention(key, dim, window_size, num_heads):
    ks = jax.random.split(key, 8)
    return {
        "w_qkv": jax.random.normal(ks[0], (3 * dim, dim), jnp.float32) * 0.05,  # (out,in)
        "q_bias": jax.random.normal(ks[1], (dim,), jnp.float32) * 0.02,
        "v_bias": jax.random.normal(ks[2], (dim,), jnp.float32) * 0.02,
        "logit_scale": jnp.log(10.0 * jnp.ones((num_heads, 1, 1), jnp.float32)),
        "cpb_w1": jax.random.normal(ks[3], (512, 2), jnp.float32) * 0.1,
        "cpb_b1": jax.random.normal(ks[4], (512,), jnp.float32) * 0.1,
        "cpb_w2": jax.random.normal(ks[5], (num_heads, 512), jnp.float32) * 0.05,
        "w_proj": jax.random.normal(ks[6], (dim, dim), jnp.float32) * 0.05,
        "b_proj": jax.random.normal(ks[7], (dim,), jnp.float32) * 0.02,
    }


# ---------------------------- pure-JAX reference ----------------------------

def window_attention_ref(x, params, window_size, num_heads):
    with jax.default_matmul_precision("float32"):
        B_, N, C = x.shape
        hd = C // num_heads
        qkv_bias = jnp.concatenate([params["q_bias"],
                                    jnp.zeros_like(params["v_bias"]),
                                    params["v_bias"]])
        qkv = x @ params["w_qkv"].T + qkv_bias
        qkv = qkv.reshape(B_, N, 3, num_heads, hd).transpose(2, 0, 3, 1, 4)
        q, k, v = qkv[0], qkv[1], qkv[2]
        qn = q / jnp.maximum(jnp.sqrt(jnp.sum(q * q, -1, keepdims=True)), 1e-12)
        kn = k / jnp.maximum(jnp.sqrt(jnp.sum(k * k, -1, keepdims=True)), 1e-12)
        attn = qn @ jnp.swapaxes(kn, -1, -2)
        logit_scale = jnp.exp(jnp.minimum(params["logit_scale"], jnp.log(1.0 / 0.01)))
        attn = attn * logit_scale                                    # (B_,H,N,N)*(H,1,1)
        coords = make_relative_coords_table(window_size)
        rel_index = make_relative_position_index(window_size)
        h1 = jnp.maximum(coords @ params["cpb_w1"].T + params["cpb_b1"], 0.0)
        table = h1 @ params["cpb_w2"].T
        rpb = jnp.take(table, rel_index.reshape(-1), axis=0).reshape(N, N, num_heads)
        rpb = 16.0 * jax.nn.sigmoid(jnp.transpose(rpb, (2, 0, 1)))
        attn = jax.nn.softmax(attn + rpb[None], axis=-1)
        out = jnp.swapaxes(attn @ v, 1, 2).reshape(B_, N, C)
        return out @ params["w_proj"].T + params["b_proj"]


# ---------------------------- main ----------------------------

if __name__ == "__main__":
    key = jax.random.PRNGKey(0)
    kx, kp = jax.random.split(key)

    dim, window_size, num_heads = 32, (8, 8), 4       # N = 64, head_dim = 8
    B_ = 4                                            # batch * num_windows
    N = window_size[0] * window_size[1]

    x = jax.random.normal(kx, (B_, N, dim), jnp.float32)
    params = init_window_attention(kp, dim, window_size, num_heads)

    ref = jax.block_until_ready(
        window_attention_ref(x, params, window_size, num_heads))

    # f32 MXU operands (exact path, all generations). Bb=2 -> 2 parallel steps.
    prep32 = prepare_window_attention(params, window_size, num_heads, jnp.float32)
    out32 = jax.block_until_ready(
        window_attention_forward(x, prep32, window_size, num_heads))
    assert out32.shape == (B_, N, dim), out32.shape
    err32 = float(jnp.max(jnp.abs(out32 - ref)))
    assert jnp.allclose(out32, ref, atol=1e-3, rtol=1e-3), f"f32 max abs err {err32}"

    # bf16 MXU operands (v6e/v7x fast path); softmax/normalize math stays f32.
    prep16 = prepare_window_attention(params, window_size, num_heads, jnp.bfloat16)
    out16 = jax.block_until_ready(
        window_attention_forward(x, prep16, window_size, num_heads))
    err16 = float(jnp.max(jnp.abs(out16 - ref)))
    assert jnp.allclose(out16, ref, atol=5e-2, rtol=5e-2), f"bf16 max abs err {err16}"

    print("KERNEL_OK")
</pallas_src>

<mosaic_0001>
module attributes {stable_mosaic.version = 11 : i64} {
  func.func @_cpb_mlp_kernel(%arg0: memref<225x8xf32, #tpu.memory_space<vmem>>, %arg1: memref<8x512xf32, #tpu.memory_space<vmem>>, %arg2: memref<1x512xf32, #tpu.memory_space<vmem>>, %arg3: memref<512x4xf32, #tpu.memory_space<vmem>>, %arg4: memref<225x4xf32, #tpu.memory_space<vmem>>) attributes {dimension_semantics = [], scalar_prefetch = 0 : i64, scratch_operands = 0 : i64, tpu.core_type = #tpu.core_type<tc>} {
    %c0 = arith.constant 0 : index
    %c0_0 = arith.constant 0 : index
    %0 = vector.load %arg0[%c0, %c0_0] : memref<225x8xf32, #tpu.memory_space<vmem>>, vector<225x8xf32>
    %c0_1 = arith.constant 0 : index
    %c0_2 = arith.constant 0 : index
    %1 = vector.load %arg1[%c0_1, %c0_2] : memref<8x512xf32, #tpu.memory_space<vmem>>, vector<8x512xf32>
    %cst = arith.constant dense<0.000000e+00> : vector<225x512xf32>
    %2 = tpu.matmul %0, %1, %cst {dimension_numbers = #tpu.dot_dimension_numbers<[1], [0], [0], [1], [0, 0, 1, 1], [], []>} : vector<225x8xf32>, vector<8x512xf32>, vector<225x512xf32> -> vector<225x512xf32>
    %c0_3 = arith.constant 0 : index
    %c0_4 = arith.constant 0 : index
    %3 = vector.load %arg2[%c0_3, %c0_4] : memref<1x512xf32, #tpu.memory_space<vmem>>, vector<1x512xf32>
    %4 = vector.broadcast %3 : vector<1x512xf32> to vector<225x512xf32>
    %5 = arith.addf %2, %4 : vector<225x512xf32>
    %cst_5 = arith.constant 0.000000e+00 : f32
    %6 = vector.broadcast %cst_5 : f32 to vector<225x512xf32>
    %7 = arith.maximumf %5, %6 : vector<225x512xf32>
    %c0_6 = arith.constant 0 : index
    %c0_7 = arith.constant 0 : index
    %8 = vector.load %arg3[%c0_6, %c0_7] : memref<512x4xf32, #tpu.memory_space<vmem>>, vector<512x4xf32>
    %cst_8 = arith.constant dense<0.000000e+00> : vector<225x4xf32>
    %9 = tpu.matmul %7, %8, %cst_8 {dimension_numbers = #tpu.dot_dimension_numbers<[1], [0], [0], [1], [0, 0, 1, 1], [], []>} : vector<225x512xf32>, vector<512x4xf32>, vector<225x4xf32> -> vector<225x4xf32>
    %10 = arith.negf %9 : vector<225x4xf32>
    %11 = math.exp %10 : vector<225x4xf32>
    %cst_9 = arith.constant 1.000000e+00 : f32
    %12 = vector.broadcast %cst_9 : f32 to vector<225x4xf32>
    %13 = arith.addf %12, %11 : vector<225x4xf32>
    %14 = arith.divf %12, %13 : vector<225x4xf32>
    %cst_10 = arith.constant 1.600000e+01 : f32
    %15 = vector.broadcast %cst_10 : f32 to vector<225x4xf32>
    %16 = arith.mulf %15, %14 : vector<225x4xf32>
    %c0_11 = arith.constant 0 : index
    %c0_12 = arith.constant 0 : index
    %17 = vector.load %arg4[%c0_11, %c0_12] : memref<225x4xf32, #tpu.memory_space<vmem>>, vector<225x4xf32>
    tpu.vector_store %arg4[%c0_11, %c0_12], %16 {strides = array<i32>} : memref<225x4xf32, #tpu.memory_space<vmem>>, vector<225x4xf32>,
    return
  }
}

</mosaic_0001>

<bundles_post_ra>
// kernel: tpu_custom_call.1
= control target key start
LH: loop header
LB: loop body
LE: loop exit
PB: predicated region body
PF: predicated region fallthrough
CT: control target
= control target key end

     0   :  { %v1806_v3 = vmov 0.0   ;;  %vm72_vm0 = vcmask 64512   ;;  %v1807_v7 = vmov 0.0|0.0   ;;  %vm1441_vm1 = vcmask 31744   ;;  %s2514_s1 = inlined_call_operand.vmem [shape: f32[8,512], index: 1, kind: input, shape index: {}]   ;;  %s2515_s0 = inlined_call_operand.vmem [shape: f32[225,8], index: 0, kind: input, shape index: {}]   ;;  %s2516_s3 = inlined_call_operand.vmem [shape: f32[512,4], index: 3, kind: input, shape index: {}]   ;;  %s2517_s2 = inlined_call_operand.vmem [shape: f32[1,512], index: 2, kind: input, shape index: {}]   ;;  %s2518_s4 = inlined_call_operand.vmem [shape: f32[225,4], index: 4, kind: output, shape index: {}]  }
   0x1   :  { %v47_v0 = vld [vmem:[%s2514_s1 + $0x8] sm:$0xff]  ;;  %v49_v1 = vld [vmem:[%s2514_s1 + $0x18] sm:$0xff]  ;;  %v46_v2 = vld [vmem:[%s2514_s1] sm:$0xff]  ;;  %224 = vmatprep.mubr.f32.mxu0 %v1806_v3  ;;  %463 = vmatprep.mubr.f32.mxu1 %v1806_v3  ;;  %vm1470_vm2 = vcmask 24576  }
   0x2   :  { %160 = vmatprep.subr.mxu0 %v47_v0  ;;  %399 = vmatprep.subr.mxu1 %v49_v1  ;;  %v48_v4 = vld [vmem:[%s2514_s1 + $0x10] sm:$0xff]  ;;  %v17_v5 = vld [vmem:[%s2515_s0] sm:$0xff]  ;;  %v18_v6 = vld [vmem:[%s2515_s0 + $0x8] sm:$0xff] }
   0x3   :  { %161 = vmatpush1.msra.mxu0 %v46_v2  ;;  %400 = vmatpush1.msra.mxu1 %v48_v4  ;;  %v19_v8 = vld [vmem:[%s2515_s0 + $0x10] sm:$0xff]  ;;  %v754_v9 = vld [vmem:[%s2516_s3] sm:$0xff]  ;;  %v755_v10 = vld [vmem:[%s2516_s3 + $0x8] sm:$0xff] }
   0x4   :  { %1476 = vmatmul.mubr.msk.f32.vlgmr.msra.gmra.mrb[0].mxu0 %vm72_vm0, %v17_v5  ;;  %1505 = vmatmul.mubr.msk.f32.vlgmr.msra.gmra.mrb[0].mxu1 %vm72_vm0, %v17_v5  ;;  %v786_v11 = vld [vmem:[%s2516_s3 + $0x100] sm:$0xff]  ;;  %v20_v12 = vld [vmem:[%s2515_s0 + $0x18] sm:$0xff]  ;;  %v1564_v13 = vpack.c.bf16 %v755_v10, %v754_v9  ;;  %v787_v14 = vld [vmem:[%s2516_s3 + $0x108] sm:$0xff] }
   0x5   :  { %230 = vmatprep.mubr.f32.mxu0 %v1806_v3  ;;  %469 = vmatprep.mubr.f32.mxu1 %v1806_v3  ;;  %v1612_v15 = vpack.c.bf16 %v787_v14, %v786_v11  ;;  %v756_v16 = vld [vmem:[%s2516_s3 + $0x10] sm:$0xff]  ;;  %v757_v17 = vld [vmem:[%s2516_s3 + $0x18] sm:$0xff]  ;;  %v758_v22 = vld [vmem:[%s2516_s3 + $0x20] sm:$0xff] }
   0x6   :  { %1563 = vmatprep.subr.bf16.mxu1 %v1807_v7  ;;  %1611 = vmatprep.subr.bf16.mxu0 %v1807_v7  ;;  %v788_v18 = vld [vmem:[%s2516_s3 + $0x110] sm:$0xff]  ;;  %v1567_v19 = vpack.c.bf16 %v757_v17, %v756_v16  ;;  %v789_v20 = vld [vmem:[%s2516_s3 + $0x118] sm:$0xff]  ;;  %v759_v23 = vld [vmem:[%s2516_s3 + $0x28] sm:$0xff] }
   0x7   :  { %1565 = vmatpush1.bf16.msra.mxu1 %v1564_v13  ;;  %1613 = vmatpush1.bf16.msra.mxu0 %v1612_v15  ;;  %v1615_v21 = vpack.c.bf16 %v789_v20, %v788_v18  ;;  %v790_v24 = vld [vmem:[%s2516_s3 + $0x120] sm:$0xff]  ;;  %v791_v25 = vld [vmem:[%s2516_s3 + $0x128] sm:$0xff]  ;;  %v1570_v27 = vpack.c.bf16 %v759_v23, %v758_v22  ;;  %v760_v29 = vld [vmem:[%s2516_s3 + $0x30] sm:$0xff] }
   0x8   :  { %1477 = vmatmul.mubr.msk.f32.gmra.mrb[2].mxu0 %vm72_vm0, %v18_v6  ;;  %1506 = vmatmul.mubr.msk.f32.gmra.mrb[2].mxu1 %vm72_vm0, %v18_v6  ;;  %v21_v26 = vld [vmem:[%s2515_s0 + $0x20] sm:$0xff]  ;;  %v1618_v28 = vpack.c.bf16 %v791_v25, %v790_v24  ;;  %v761_v30 = vld [vmem:[%s2516_s3 + $0x38] sm:$0xff]  ;;  %v792_v31 = vld [vmem:[%s2516_s3 + $0x130] sm:$0xff] }
   0x9   :  { %236 = vmatprep.mubr.f32.mxu0 %v1806_v3  ;;  %475 = vmatprep.mubr.f32.mxu1 %v1806_v3  ;;  %v793_v32 = vld [vmem:[%s2516_s3 + $0x138] sm:$0xff]  ;;  %v22_v33 = vld [vmem:[%s2515_s0 + $0x28] sm:$0xff]  ;;  %v1573_v34 = vpack.c.bf16 %v761_v30, %v760_v29  ;;  %v762_v36 = vld [vmem:[%s2516_s3 + $0x40] sm:$0xff] }
   0xa   :  { %1566 = vmatprep.subr.bf16.mxu1 %v1807_v7  ;;  %1614 = vmatprep.subr.bf16.mxu0 %v1807_v7  ;;  %v1621_v35 = vpack.c.bf16 %v793_v32, %v792_v31  ;;  %v763_v37 = vld [vmem:[%s2516_s3 + $0x48] sm:$0xff]  ;;  %v794_v38 = vld [vmem:[%s2516_s3 + $0x140] sm:$0xff]  ;;  %v23_v40 = vld [vmem:[%s2515_s0 + $0x30] sm:$0xff] }
   0xb   :  { %1568 = vmatpush1.bf16.msra.mxu1 %v1567_v19  ;;  %1616 = vmatpush1.bf16.msra.mxu0 %v1615_v21  ;;  %v795_v39 = vld [vmem:[%s2516_s3 + $0x148] sm:$0xff]  ;;  %v1576_v41 = vpack.c.bf16 %v763_v37, %v762_v36  ;;  %v764_v43 = vld [vmem:[%s2516_s3 + $0x50] sm:$0xff]  ;;  %v765_v44 = vld [vmem:[%s2516_s3 + $0x58] sm:$0xff] }
   0xc   :  { %1478 = vmatmul.mubr.msk.f32.gmra.mrb[4].mxu0 %vm72_vm0, %v19_v8  ;;  %1507 = vmatmul.mubr.msk.f32.gmra.mrb[4].mxu1 %vm72_vm0, %v19_v8  ;;  %v1624_v42 = vpack.c.bf16 %v795_v39, %v794_v38  ;;  %v796_v45 = vld [vmem:[%s2516_s3 + $0x150] sm:$0xff]  ;;  %v797_v46 = vld [vmem:[%s2516_s3 + $0x158] sm:$0xff]  ;;  %v1579_v48 = vpack.c.bf16 %v765_v44, %v764_v43  ;;  %v766_v50 = vld [vmem:[%s2516_s3 + $0x60] sm:$0xff] }
   0xd   :  { %242 = vmatprep.mubr.f32.mxu0 %v1806_v3  ;;  %481 = vmatprep.mubr.f32.mxu1 %v1806_v3  ;;  %v24_v47 = vld [vmem:[%s2515_s0 + $0x38] sm:$0xff]  ;;  %v1627_v49 = vpack.c.bf16 %v797_v46, %v796_v45  ;;  %v767_v51 = vld [vmem:[%s2516_s3 + $0x68] sm:$0xff]  ;;  %v798_v52 = vld [vmem:[%s2516_s3 + $0x160] sm:$0xff] }
   0xe   :  { %1569 = vmatprep.subr.bf16.mxu1 %v1807_v7  ;;  %1617 = vmatprep.subr.bf16.mxu0 %v1807_v7  ;;  %v799_v53 = vld [vmem:[%s2516_s3 + $0x168] sm:$0xff]  ;;  %v25_v54 = vld [vmem:[%s2515_s0 + $0x40] sm:$0xff]  ;;  %v1582_v55 = vpack.c.bf16 %v767_v51, %v766_v50  ;;  %v768_v57 = vld [vmem:[%s2516_s3 + $0x70] sm:$0xff] }
   0xf   :  { %1571 = vmatpush1.bf16.msra.mxu1 %v1570_v27  ;;  %1619 = vmatpush1.bf16.msra.mxu0 %v1618_v28  ;;  %v1630_v56 = vpack.c.bf16 %v799_v53, %v798_v52  ;;  %v769_v58 = vld [vmem:[%s2516_s3 + $0x78] sm:$0xff]  ;;  %v800_v59 = vld [vmem:[%s2516_s3 + $0x170] sm:$0xff]  ;;  %v26_v61 = vld [vmem:[%s2515_s0 + $0x48] sm:$0xff] }
  0x10   :  { %1479 = vmatmul.mubr.msk.f32.gmra.mrb[6].mxu0 %vm72_vm0, %v20_v12  ;;  %1508 = vmatmul.mubr.msk.f32.gmra.mrb[6].mxu1 %vm72_vm0, %v20_v12  ;;  %v801_v60 = vld [vmem:[%s2516_s3 + $0x178] sm:$0xff]  ;;  %v1585_v62 = vpack.c.bf16 %v769_v58, %v768_v57  ;;  %v770_v0 = vld [vmem:[%s2516_s3 + $0x80] sm:$0xff]  ;;  %v771_v1 = vld [vmem:[%s2516_s3 + $0x88] sm:$0xff] }
  0x11   :  { %248 = vmatprep.mubr.f32.mxu0 %v1806_v3  ;;  %487 = vmatprep.mubr.f32.mxu1 %v1806_v3  ;;  %v1633_v63 = vpack.c.bf16 %v801_v60, %v800_v59  ;;  %v802_v2 = vld [vmem:[%s2516_s3 + $0x180] sm:$0xff]  ;;  %v803_v4 = vld [vmem:[%s2516_s3 + $0x188] sm:$0xff]  ;;  %v27_v5 = vld [vmem:[%s2515_s0 + $0x50] sm:$0xff]  ;;  %v1588_v6 = vpack.c.bf16 %v771_v1, %v770_v0 }
  0x12   :  { %1572 = vmatprep.subr.bf16.mxu1 %v1807_v7  ;;  %1620 = vmatprep.subr.bf16.mxu0 %v1807_v7  ;;  %v1636_v8 = vpack.c.bf16 %v803_v4, %v802_v2  ;;  %v772_v9 = vld [vmem:[%s2516_s3 + $0x90] sm:$0xff]  ;;  %v773_v10 = vld [vmem:[%s2516_s3 + $0x98] sm:$0xff]  ;;  %v774_v16 = vld [vmem:[%s2516_s3 + $0xa0] sm:$0xff] }
  0x13   :  { %1574 = vmatpush1.bf16.msra.mxu1 %v1573_v34  ;;  %1622 = vmatpush1.bf16.msra.mxu0 %v1621_v35  ;;  %v804_v11 = vld [vmem:[%s2516_s3 + $0x190] sm:$0xff]  ;;  %v805_v12 = vld [vmem:[%s2516_s3 + $0x198] sm:$0xff]  ;;  %v1591_v14 = vpack.c.bf16 %v773_v10, %v772_v9  ;;  %v775_v17 = vld [vmem:[%s2516_s3 + $0xa8] sm:$0xff] }
  0x14   :  { %1480 = vmatmul.mubr.msk.f32.gmra.mrb[8].mxu0 %vm72_vm0, %v21_v26  ;;  %1509 = vmatmul.mubr.msk.f32.gmra.mrb[8].mxu1 %vm72_vm0, %v21_v26  ;;  %v28_v13 = vld [vmem:[%s2515_s0 + $0x58] sm:$0xff]  ;;  %v1639_v15 = vpack.c.bf16 %v805_v12, %v804_v11  ;;  %v806_v18 = vld [vmem:[%s2516_s3 + $0x1a0] sm:$0xff]  ;;  %v807_v19 = vld [vmem:[%s2516_s3 + $0x1a8] sm:$0xff]  ;;  %v1594_v21 = vpack.c.bf16 %v775_v17, %v774_v16 }
  0x15   :  { %254 = vmatprep.mubr.f32.mxu0 %v1806_v3  ;;  %493 = vmatprep.mubr.f32.mxu1 %v1806_v3  ;;  %v29_v20 = vld [vmem:[%s2515_s0 + $0x60] sm:$0xff]  ;;  %v1642_v22 = vpack.c.bf16 %v807_v19, %v806_v18  ;;  %v776_v23 = vld [vmem:[%s2516_s3 + $0xb0] sm:$0xff]  ;;  %v777_v24 = vld [vmem:[%s2516_s3 + $0xb8] sm:$0xff] }
  0x16   :  { %1575 = vmatprep.subr.bf16.mxu1 %v1807_v7  ;;  %1623 = vmatprep.subr.bf16.mxu0 %v1807_v7  ;;  %v808_v25 = vld [vmem:[%s2516_s3 + $0x1b0] sm:$0xff]  ;;  %v809_v26 = vld [vmem:[%s2516_s3 + $0x1b8] sm:$0xff]  ;;  %v30_v27 = vld [vmem:[%s2515_s0 + $0x68] sm:$0xff]  ;;  %v1597_v28 = vpack.c.bf16 %v777_v24, %v776_v23 }
  0x17   :  { %1577 = vmatpush1.bf16.msra.mxu1 %v1576_v41  ;;  %1625 = vmatpush1.bf16.msra.mxu0 %v1624_v42  ;;  %v1645_v29 = vpack.c.bf16 %v809_v26, %v808_v25  ;;  %v778_v30 = vld [vmem:[%s2516_s3 + $0xc0] sm:$0xff]  ;;  %v779_v31 = vld [vmem:[%s2516_s3 + $0xc8] sm:$0xff]  ;;  %v31_v34 = vld [vmem:[%s2515_s0 + $0x70] sm:$0xff] }
  0x18   :  { %1481 = vmatmul.mubr.msk.f32.gmra.mrb[10].mxu0 %vm72_vm0, %v22_v33  ;;  %1510 = vmatmul.mubr.msk.f32.gmra.mrb[10].mxu1 %vm72_vm0, %v22_v33  ;;  %v810_v32 = vld [vmem:[%s2516_s3 + $0x1c0] sm:$0xff]  ;;  %v811_v33 = vld [vmem:[%s2516_s3 + $0x1c8] sm:$0xff]  ;;  %v1600_v35 = vpack.c.bf16 %v779_v31, %v778_v30  ;;  %v780_v37 = vld [vmem:[%s2516_s3 + $0xd0] sm:$0xff] }
  0x19   :  { %260 = vmatprep.mubr.f32.mxu0 %v1806_v3  ;;  %499 = vmatprep.mubr.f32.mxu1 %v1806_v3  ;;  %v1648_v36 = vpack.c.bf16 %v811_v33, %v810_v32  ;;  %v781_v38 = vld [vmem:[%s2516_s3 + $0xd8] sm:$0xff]  ;;  %v812_v39 = vld [vmem:[%s2516_s3 + $0x1d0] sm:$0xff]  ;;  %v782_v44 = vld [vmem:[%s2516_s3 + $0xe0] sm:$0xff] }
  0x1a   :  { %1578 = vmatprep.subr.bf16.mxu1 %v1807_v7  ;;  %1626 = vmatprep.subr.bf16.mxu0 %v1807_v7  ;;  %v32_v41 = vld [vmem:[%s2515_s0 + $0x78] sm:$0xff]  ;;  %v1603_v42 = vpack.c.bf16 %v781_v38, %v780_v37  ;;  %v783_v45 = vld [vmem:[%s2516_s3 + $0xe8] sm:$0xff]  ;;  %v814_v46 = vld [vmem:[%s2516_s3 + $0x1e0] sm:$0xff] }
  0x1b   :  { %1580 = vmatpush1.bf16.msra.mxu1 %v1579_v48  ;;  %1628 = vmatpush1.bf16.msra.mxu0 %v1627_v49  ;;  %v33_v48 = vld [vmem:[%s2515_s0 + $0x80] sm:$0xff]  ;;  %v1606_v49 = vpack.c.bf16 %v783_v45, %v782_v44  ;;  %v34_v51 = vld [vmem:[%s2515_s0 + $0x88] sm:$0xff]  ;;  %v35_v52 = vld [vmem:[%s2515_s0 + $0x90] sm:$0xff] }
  0x1c   :  { %1482 = vmatmul.mubr.msk.f32.gmra.mrb[12].mxu0 %vm72_vm0, %v23_v40  ;;  %1511 = vmatmul.mubr.msk.f32.gmra.mrb[12].mxu1 %vm72_vm0, %v23_v40  ;;  %v813_v40 = vld [vmem:[%s2516_s3 + $0x1d8] sm:$0xff]  ;;  %v816_v57 = vld [vmem:[%s2516_s3 + $0x1f0] sm:$0xff]  ;;  %v42_v0 = vld [vmem:[%s2515_s0 + $0xc8] sm:$0xff] }
  0x1d   :  { %266 = vmatprep.mubr.f32.mxu0 %v1806_v3  ;;  %505 = vmatprep.mubr.f32.mxu1 %v1806_v3  ;;  %v1651_v43 = vpack.c.bf16 %v813_v40, %v812_v39  ;;  %v36_v53 = vld [vmem:[%s2515_s0 + $0x98] sm:$0xff]  ;;  %v39_v58 = vld [vmem:[%s2515_s0 + $0xb0] sm:$0xff]  ;;  %v45_v4 = vld [vmem:[%s2515_s0 + $0xe0] sm:$0x1] }
  0x1e   :  { %1581 = vmatprep.subr.bf16.mxu1 %v1807_v7  ;;  %1629 = vmatprep.subr.bf16.mxu0 %v1807_v7  ;;  %v817_v60 = vld [vmem:[%s2516_s3 + $0x1f8] sm:$0xff]  ;;  %v43_v1 = vld [vmem:[%s2515_s0 + $0xd0] sm:$0xff]  ;;  %v50_v10 = vld [vmem:[%s2517_s2] sm:$0xf] }
  0x1f   :  { %1583 = vmatpush1.bf16.msra.mxu1 %v1582_v55  ;;  %1631 = vmatpush1.bf16.msra.mxu0 %v1630_v56  ;;  %v784_v55 = vld [vmem:[%s2516_s3 + $0xf0] sm:$0xff]  ;;  %v785_v56 = vld [vmem:[%s2516_s3 + $0xf8] sm:$0xff] }
  0x20   :  { %1483 = vmatmul.mubr.msk.f32.gmra.mrb[14].mxu0 %vm72_vm0, %v24_v47  ;;  %1512 = vmatmul.mubr.msk.f32.gmra.mrb[14].mxu1 %vm72_vm0, %v24_v47  ;;  %v815_v47 = vld [vmem:[%s2516_s3 + $0x1e8] sm:$0xff]  ;;  %v1609_v59 = vpack.c.bf16 %v785_v56, %v784_v55  ;;  %v44_v2 = vld [vmem:[%s2515_s0 + $0xd8] sm:$0xff] }
  0x21   :  { %272 = vmatprep.mubr.f32.mxu0 %v1806_v3  ;;  %511 = vmatprep.mubr.f32.mxu1 %v1806_v3  ;;  %v1654_v50 = vpack.c.bf16 %v815_v47, %v814_v46 }
  0x22   :  { %1584 = vmatprep.subr.bf16.mxu1 %v1807_v7  ;;  %1632 = vmatprep.subr.bf16.mxu0 %v1807_v7 }
  0x23   :  { %1586 = vmatpush1.bf16.msra.mxu1 %v1585_v62  ;;  %1634 = vmatpush1.bf16.msra.mxu0 %v1633_v63  ;;  %v40_v62 = vld [vmem:[%s2515_s0 + $0xb8] sm:$0xff]  ;;  %v41_v63 = vld [vmem:[%s2515_s0 + $0xc0] sm:$0xff] }
  0x24   :  { %1484 = vmatmul.mubr.msk.f32.gmra.mrb[16].mxu0 %vm72_vm0, %v25_v54  ;;  %1513 = vmatmul.mubr.msk.f32.gmra.mrb[16].mxu1 %vm72_vm0, %v25_v54  ;;  %v38_v54 = vld [vmem:[%s2515_s0 + $0xa8] sm:$0xff] }
  0x25   :  { %278 = vmatprep.mubr.f32.mxu0 %v1806_v3  ;;  %517 = vmatprep.mubr.f32.mxu1 %v1806_v3 }
  0x26   :  { %1587 = vmatprep.subr.bf16.mxu1 %v1807_v7  ;;  %1635 = vmatprep.subr.bf16.mxu0 %v1807_v7 }
  0x27   :  { %1589 = vmatpush1.bf16.msra.mxu1 %v1588_v6  ;;  %1637 = vmatpush1.bf16.msra.mxu0 %v1636_v8 }
  0x28   :  { %1485 = vmatmul.mubr.msk.f32.gmra.mrb[18].mxu0 %vm72_vm0, %v26_v61  ;;  %1514 = vmatmul.mubr.msk.f32.gmra.mrb[18].mxu1 %vm72_vm0, %v26_v61  ;;  %v1657_v61 = vpack.c.bf16 %v817_v60, %v816_v57 }
  0x29   :  { %284 = vmatprep.mubr.f32.mxu0 %v1806_v3  ;;  %523 = vmatprep.mubr.f32.mxu1 %v1806_v3 }
  0x2a   :  { %1590 = vmatprep.subr.bf16.mxu1 %v1807_v7  ;;  %1638 = vmatprep.subr.bf16.mxu0 %v1807_v7 }
  0x2b   :  { %1592 = vmatpush1.bf16.msra.mxu1 %v1591_v14  ;;  %1640 = vmatpush1.bf16.msra.mxu0 %v1639_v15 }
  0x2c   :  { %1486 = vmatmul.mubr.msk.f32.gmra.mrb[20].mxu0 %vm72_vm0, %v27_v5  ;;  %1515 = vmatmul.mubr.msk.f32.gmra.mrb[20].mxu1 %vm72_vm0, %v27_v5  ;;  %v52_v5 = vlaneseq }
  0x2d   :  { %290 = vmatprep.mubr.f32.mxu0 %v1806_v3  ;;  %529 = vmatprep.mubr.f32.mxu1 %v1806_v3 }
  0x2e   :  { %1593 = vmatprep.subr.bf16.mxu1 %v1807_v7  ;;  %1641 = vmatprep.subr.bf16.mxu0 %v1807_v7  ;;  %v53_v6 = vshrl.u32 %v52_v5, 7 }
  0x2f   :  { %1595 = vmatpush1.bf16.msra.mxu1 %v1594_v21  ;;  %1643 = vmatpush1.bf16.msra.mxu0 %v1642_v22 }
  0x30   :  { %1487 = vmatmul.mubr.msk.f32.gmra.mrb[22].mxu0 %vm72_vm0, %v28_v13  ;;  %1516 = vmatmul.mubr.msk.f32.gmra.mrb[22].mxu1 %vm72_vm0, %v28_v13  ;;  %v54_v8 = vsub.s32 0, %v53_v6  ;;  %v62_v9 = vsub.s32 2, %v53_v6  ;;  %v58_v11 = vsub.s32 1, %v53_v6  ;;  %v66_v12 = vsub.s32 3, %v53_v6 }
  0x31   :  { %296 = vmatprep.mubr.f32.mxu0 %v1806_v3  ;;  %535 = vmatprep.mubr.f32.mxu1 %v1806_v3 }
  0x32   :  { %1596 = vmatprep.subr.bf16.mxu1 %v1807_v7  ;;  %1644 = vmatprep.subr.bf16.mxu0 %v1807_v7  ;;  %v2275_v13 = vrot.slane %v50_v10, %v54_v8  ;;  %v2279_v14 = vrot.slane %v50_v10, %v58_v11  ;;  %v2281_v15 = vrot.slane %v50_v10, %v66_v12 }
  0x33   :  { %1598 = vmatpush1.bf16.msra.mxu1 %v1597_v28  ;;  %1646 = vmatpush1.bf16.msra.mxu0 %v1645_v29 }
  0x34   :  { %1488 = vmatmul.mubr.msk.f32.gmra.mrb[24].mxu0 %vm72_vm0, %v29_v20  ;;  %1517 = vmatmul.mubr.msk.f32.gmra.mrb[24].mxu1 %vm72_vm0, %v29_v20 }
  0x35   :  { %302 = vmatprep.mubr.f32.mxu0 %v1806_v3  ;;  %541 = vmatprep.mubr.f32.mxu1 %v1806_v3 }
  0x36   :  { %1599 = vmatprep.subr.bf16.mxu1 %v1807_v7  ;;  %1647 = vmatprep.subr.bf16.mxu0 %v1807_v7 }
  0x37   :  { %1601 = vmatpush1.bf16.msra.mxu1 %v1600_v35  ;;  %1649 = vmatpush1.bf16.msra.mxu0 %v1648_v36 }
  0x38   :  { %1489 = vmatmul.mubr.msk.f32.gmra.mrb[26].mxu0 %vm72_vm0, %v30_v27  ;;  %1518 = vmatmul.mubr.msk.f32.gmra.mrb[26].mxu1 %vm72_vm0, %v30_v27 }
  0x39   :  { %308 = vmatprep.mubr.f32.mxu0 %v1806_v3  ;;  %547 = vmatprep.mubr.f32.mxu1 %v1806_v3 }
  0x3a   :  { %1602 = vmatprep.subr.bf16.mxu1 %v1807_v7  ;;  %1650 = vmatprep.subr.bf16.mxu0 %v1807_v7 }
  0x3b   :  { %1604 = vmatpush1.bf16.msra.mxu1 %v1603_v42  ;;  %1652 = vmatpush1.bf16.msra.mxu0 %v1651_v43 }
  0x3c   :  { %1490 = vmatmul.mubr.msk.f32.gmra.mrb[28].mxu0 %vm72_vm0, %v31_v34  ;;  %1519 = vmatmul.mubr.msk.f32.gmra.mrb[28].mxu1 %vm72_vm0, %v31_v34 }
  0x3d   :  { %314 = vmatprep.mubr.f32.mxu0 %v1806_v3  ;;  %553 = vmatprep.mubr.f32.mxu1 %v1806_v3 }
  0x3e   :  { %1605 = vmatprep.subr.bf16.mxu1 %v1807_v7  ;;  %1653 = vmatprep.subr.bf16.mxu0 %v1807_v7 }
  0x3f   :  { %1607 = vmatpush1.bf16.msra.mxu1 %v1606_v49  ;;  %1655 = vmatpush1.bf16.msra.mxu0 %v1654_v50 }
  0x40   :  { %1491 = vmatmul.mubr.msk.f32.gmra.mrb[30].mxu0 %vm72_vm0, %v32_v41  ;;  %1520 = vmatmul.mubr.msk.f32.gmra.mrb[30].mxu1 %vm72_vm0, %v32_v41 }
  0x41   :  { %320 = vmatprep.mubr.f32.mxu0 %v1806_v3  ;;  %559 = vmatprep.mubr.f32.mxu1 %v1806_v3 }
  0x42   :  { %1608 = vmatprep.subr.bf16.mxu1 %v1807_v7  ;;  %1656 = vmatprep.subr.bf16.mxu0 %v1807_v7  ;;  %v37_v7 = vld [vmem:[%s2515_s0 + $0xa0] sm:$0xff] }
  0x43   :  { %1610 = vmatpush1.bf16.msra.mxu1 %v1609_v59  ;;  %1658 = vmatpush1.bf16.msra.mxu0 %v1657_v61 }
  0x44   :  { %1492 = vmatmul.mubr.msk.f32.gmra.mrb[32].mxu0 %vm72_vm0, %v33_v48  ;;  %1521 = vmatmul.mubr.msk.f32.gmra.mrb[32].mxu1 %vm72_vm0, %v33_v48 }
  0x45   :  { %326 = vmatprep.mubr.f32.mxu0 %v1806_v3  ;;  %565 = vmatprep.mubr.f32.mxu1 %v1806_v3 }
  0x48   :  { %1493 = vmatmul.mubr.msk.f32.gmra.mrb[34].mxu0 %vm72_vm0, %v34_v51  ;;  %1522 = vmatmul.mubr.msk.f32.gmra.mrb[34].mxu1 %vm72_vm0, %v34_v51 }
  0x49   :  { %332 = vmatprep.mubr.f32.mxu0 %v1806_v3  ;;  %571 = vmatprep.mubr.f32.mxu1 %v1806_v3 }
  0x4c   :  { %1494 = vmatmul.mubr.msk.f32.gmra.mrb[36].mxu0 %vm72_vm0, %v35_v52  ;;  %1523 = vmatmul.mubr.msk.f32.gmra.mrb[36].mxu1 %vm72_vm0, %v35_v52 }
  0x4d   :  { %338 = vmatprep.mubr.f32.mxu0 %v1806_v3  ;;  %577 = vmatprep.mubr.f32.mxu1 %v1806_v3 }
  0x50   :  { %1495 = vmatmul.mubr.msk.f32.gmra.mrb[38].mxu0 %vm72_vm0, %v36_v53  ;;  %1524 = vmatmul.mubr.msk.f32.gmra.mrb[38].mxu1 %vm72_vm0, %v36_v53 }
  0x51   :  { %344 = vmatprep.mubr.f32.mxu0 %v1806_v3  ;;  %583 = vmatprep.mubr.f32.mxu1 %v1806_v3 }
  0x54   :  { %1496 = vmatmul.mubr.msk.f32.gmra.mrb[40].mxu0 %vm72_vm0, %v37_v7  ;;  %1525 = vmatmul.mubr.msk.f32.gmra.mrb[40].mxu1 %vm72_vm0, %v37_v7 }
  0x55   :  { %350 = vmatprep.mubr.f32.mxu0 %v1806_v3  ;;  %589 = vmatprep.mubr.f32.mxu1 %v1806_v3 }
  0x58   :  { %1497 = vmatmul.mubr.msk.f32.gmra.mrb[42].mxu0 %vm72_vm0, %v38_v54  ;;  %1526 = vmatmul.mubr.msk.f32.gmra.mrb[42].mxu1 %vm72_vm0, %v38_v54 }
  0x59   :  { %356 = vmatprep.mubr.f32.mxu0 %v1806_v3  ;;  %595 = vmatprep.mubr.f32.mxu1 %v1806_v3 }
  0x5c   :  { %1498 = vmatmul.mubr.msk.f32.gmra.mrb[44].mxu0 %vm72_vm0, %v39_v58  ;;  %1527 = vmatmul.mubr.msk.f32.gmra.mrb[44].mxu1 %vm72_vm0, %v39_v58 }
  0x5d   :  { %362 = vmatprep.mubr.f32.mxu0 %v1806_v3  ;;  %601 = vmatprep.mubr.f32.mxu1 %v1806_v3 }
  0x60   :  { %1499 = vmatmul.mubr.msk.f32.gmra.mrb[46].mxu0 %vm72_vm0, %v40_v62  ;;  %1528 = vmatmul.mubr.msk.f32.gmra.mrb[46].mxu1 %vm72_vm0, %v40_v62 }
  0x61   :  { %368 = vmatprep.mubr.f32.mxu0 %v1806_v3  ;;  %607 = vmatprep.mubr.f32.mxu1 %v1806_v3 }
  0x64   :  { %1500 = vmatmul.mubr.msk.f32.gmra.mrb[48].mxu0 %vm72_vm0, %v41_v63  ;;  %1529 = vmatmul.mubr.msk.f32.gmra.mrb[48].mxu1 %vm72_vm0, %v41_v63 }
  0x65   :  { %374 = vmatprep.mubr.f32.mxu0 %v1806_v3  ;;  %613 = vmatprep.mubr.f32.mxu1 %v1806_v3 }
  0x68   :  { %1501 = vmatmul.mubr.msk.f32.gmra.mrb[50].mxu0 %vm72_vm0, %v42_v0  ;;  %1530 = vmatmul.mubr.msk.f32.gmra.mrb[50].mxu1 %vm72_vm0, %v42_v0 }
  0x69   :  { %380 = vmatprep.mubr.f32.mxu0 %v1806_v3  ;;  %619 = vmatprep.mubr.f32.mxu1 %v1806_v3 }
  0x6c   :  { %1502 = vmatmul.mubr.msk.f32.gmra.mrb[52].mxu0 %vm72_vm0, %v43_v1  ;;  %1531 = vmatmul.mubr.msk.f32.gmra.mrb[52].mxu1 %vm72_vm0, %v43_v1 }
  0x6d   :  { %386 = vmatprep.mubr.f32.mxu0 %v1806_v3  ;;  %625 = vmatprep.mubr.f32.mxu1 %v1806_v3 }
  0x70   :  { %1503 = vmatmul.mubr.msk.f32.gmra.mrb[54].mxu0 %vm72_vm0, %v44_v2  ;;  %1532 = vmatmul.mubr.msk.f32.gmra.mrb[54].mxu1 %vm72_vm0, %v44_v2 }
  0x71   :  { %392 = vmatprep.mubr.f32.mxu0 %v1806_v3  ;;  %631 = vmatprep.mubr.f32.mxu1 %v1806_v3  ;;  %v2277_v3 = vrot.slane %v50_v10, %v62_v9 }
  0x74   :  { %1504 = vmatmul.mubr.msk.f32.gmra.mrb[56].mxu0 %vm72_vm0, %v45_v4  ;;  %1533 = vmatmul.mubr.msk.f32.gmra.mrb[56].mxu1 %vm72_vm0, %v45_v4 }
  0xd7   :  { %v226_v16 = vpop.f32.mrb[0].mxu0  ;;  %v465_v17 = vpop.f32.mrb[0].mxu1 }
  0xd8   :  { %v227_v18 = vadd.f32 %v226_v16, %v2275_v13  ;;  %v466_v19 = vadd.f32 %v465_v17, %v2277_v3  ;;  %v228_v20 = vpop.f32.mrb[1].mxu0  ;;  %v467_v21 = vpop.f32.mrb[1].mxu1 }
  0xd9   :  { %v229_v22 = vadd.f32 %v228_v20, %v2279_v14  ;;  %v468_v23 = vadd.f32 %v467_v21, %v2281_v15 }
  0xda   :  { %v638_v28 = vmax.f32 %v227_v18, 0.0  ;;  %v640_v29 = vmax.f32 %v466_v19, 0.0 }
  0xdb   :  { %v639_v24 = vmax.f32 %v229_v22, 0.0  ;;  %v641_v25 = vmax.f32 %v468_v23, 0.0  ;;  %v232_v26 = vpop.f32.mrb[2].mxu0  ;;  %v471_v27 = vpop.f32.mrb[2].mxu1 }
  0xdc   :  { %v233_v30 = vadd.f32 %v232_v26, %v2275_v13  ;;  %v472_v31 = vadd.f32 %v471_v27, %v2277_v3  ;;  %v234_v32 = vpop.f32.mrb[3].mxu0  ;;  %v473_v33 = vpop.f32.mrb[3].mxu1 }
  0xdd   :  { %v235_v34 = vadd.f32 %v234_v32, %v2279_v14  ;;  %v474_v35 = vadd.f32 %v473_v33, %v2281_v15  ;;  %882 = vmatprep.mubr.f32.mxu1 %v639_v24  ;;  %1092 = vmatprep.mubr.f32.mxu0 %v641_v25 }
  0xde   :  { %883 = vmatmul.mubr.f32.vlgmr.msra.gmra.mrb[58].mxu1 %v638_v28  ;;  %1093 = vmatmul.mubr.f32.vlgmr.msra.gmra.mrb[58].mxu0 %v640_v29  ;;  %v642_v40 = vmax.f32 %v233_v30, 0.0  ;;  %v644_v41 = vmax.f32 %v472_v31, 0.0 }
  0xdf   :  { %v643_v36 = vmax.f32 %v235_v34, 0.0  ;;  %v645_v37 = vmax.f32 %v474_v35, 0.0  ;;  %v238_v38 = vpop.f32.mrb[4].mxu0  ;;  %v477_v39 = vpop.f32.mrb[4].mxu1 }
  0xe0   :  { %v239_v42 = vadd.f32 %v238_v38, %v2275_v13  ;;  %v478_v43 = vadd.f32 %v477_v39, %v2277_v3  ;;  %v240_v44 = vpop.f32.mrb[5].mxu0  ;;  %v479_v45 = vpop.f32.mrb[5].mxu1 }
  0xe1   :  { %v241_v46 = vadd.f32 %v240_v44, %v2279_v14  ;;  %v480_v47 = vadd.f32 %v479_v45, %v2281_v15  ;;  %887 = vmatprep.mubr.f32.mxu1 %v643_v36  ;;  %1097 = vmatprep.mubr.f32.mxu0 %v645_v37 }
  0xe2   :  { %888 = vmatmul.mubr.f32.gmra.mrb[60].mxu1 %v642_v40  ;;  %1098 = vmatmul.mubr.f32.gmra.mrb[60].mxu0 %v644_v41  ;;  %v646_v52 = vmax.f32 %v239_v42, 0.0  ;;  %v648_v53 = vmax.f32 %v478_v43, 0.0 }
  0xe3   :  { %v647_v48 = vmax.f32 %v241_v46, 0.0  ;;  %v649_v49 = vmax.f32 %v480_v47, 0.0  ;;  %v244_v50 = vpop.f32.mrb[6].mxu0  ;;  %v483_v51 = vpop.f32.mrb[6].mxu1 }
  0xe4   :  { %v245_v7 = vadd.f32 %v244_v50, %v2275_v13  ;;  %v484_v54 = vadd.f32 %v483_v51, %v2277_v3  ;;  %v246_v55 = vpop.f32.mrb[7].mxu0  ;;  %v485_v56 = vpop.f32.mrb[7].mxu1 }
  0xe5   :  { %v247_v57 = vadd.f32 %v246_v55, %v2279_v14  ;;  %v486_v58 = vadd.f32 %v485_v56, %v2281_v15  ;;  %892 = vmatprep.mubr.f32.mxu1 %v647_v48  ;;  %1102 = vmatprep.mubr.f32.mxu0 %v649_v49 }
  0xe6   :  { %893 = vmatmul.mubr.f32.gmra.mrb[62].mxu1 %v646_v52  ;;  %1103 = vmatmul.mubr.f32.gmra.mrb[62].mxu0 %v648_v53  ;;  %v650_v63 = vmax.f32 %v245_v7, 0.0  ;;  %v652_v0 = vmax.f32 %v484_v54, 0.0 }
  0xe7   :  { %v651_v59 = vmax.f32 %v247_v57, 0.0  ;;  %v653_v60 = vmax.f32 %v486_v58, 0.0  ;;  %v250_v61 = vpop.f32.mrb[8].mxu0  ;;  %v489_v62 = vpop.f32.mrb[8].mxu1 }
  0xe8   :  { %v251_v1 = vadd.f32 %v250_v61, %v2275_v13  ;;  %v490_v2 = vadd.f32 %v489_v62, %v2277_v3  ;;  %v252_v4 = vpop.f32.mrb[9].mxu0  ;;  %v491_v5 = vpop.f32.mrb[9].mxu1 }
  0xe9   :  { %v253_v6 = vadd.f32 %v252_v4, %v2279_v14  ;;  %v492_v8 = vadd.f32 %v491_v5, %v2281_v15  ;;  %897 = vmatprep.mubr.f32.mxu1 %v651_v59  ;;  %1107 = vmatprep.mubr.f32.mxu0 %v653_v60 }
  0xea   :  { %898 = vmatmul.mubr.f32.gmra.mrb[64].mxu1 %v650_v63  ;;  %1108 = vmatmul.mubr.f32.gmra.mrb[64].mxu0 %v652_v0  ;;  %v654_v16 = vmax.f32 %v251_v1, 0.0  ;;  %v656_v17 = vmax.f32 %v490_v2, 0.0 }
  0xeb   :  { %v655_v9 = vmax.f32 %v253_v6, 0.0  ;;  %v657_v10 = vmax.f32 %v492_v8, 0.0  ;;  %v256_v11 = vpop.f32.mrb[10].mxu0  ;;  %v495_v12 = vpop.f32.mrb[10].mxu1 }
  0xec   :  { %v257_v18 = vadd.f32 %v256_v11, %v2275_v13  ;;  %v496_v19 = vadd.f32 %v495_v12, %v2277_v3  ;;  %v258_v20 = vpop.f32.mrb[11].mxu0  ;;  %v497_v21 = vpop.f32.mrb[11].mxu1 }
  0xed   :  { %v259_v22 = vadd.f32 %v258_v20, %v2279_v14  ;;  %v498_v23 = vadd.f32 %v497_v21, %v2281_v15  ;;  %902 = vmatprep.mubr.f32.mxu1 %v655_v9  ;;  %1112 = vmatprep.mubr.f32.mxu0 %v657_v10 }
  0xee   :  { %903 = vmatmul.mubr.f32.gmra.mrb[66].mxu1 %v654_v16  ;;  %1113 = vmatmul.mubr.f32.gmra.mrb[66].mxu0 %v656_v17  ;;  %v658_v28 = vmax.f32 %v257_v18, 0.0  ;;  %v660_v29 = vmax.f32 %v496_v19, 0.0 }
  0xef   :  { %v659_v24 = vmax.f32 %v259_v22, 0.0  ;;  %v661_v25 = vmax.f32 %v498_v23, 0.0  ;;  %v262_v26 = vpop.f32.mrb[12].mxu0  ;;  %v501_v27 = vpop.f32.mrb[12].mxu1 }
  0xf0   :  { %v263_v30 = vadd.f32 %v262_v26, %v2275_v13  ;;  %v502_v31 = vadd.f32 %v501_v27, %v2277_v3  ;;  %v264_v32 = vpop.f32.mrb[13].mxu0  ;;  %v503_v33 = vpop.f32.mrb[13].mxu1 }
  0xf1   :  { %v265_v34 = vadd.f32 %v264_v32, %v2279_v14  ;;  %v504_v35 = vadd.f32 %v503_v33, %v2281_v15  ;;  %907 = vmatprep.mubr.f32.mxu1 %v659_v24  ;;  %1117 = vmatprep.mubr.f32.mxu0 %v661_v25 }
  0xf2   :  { %908 = vmatmul.mubr.f32.gmra.mrb[68].mxu1 %v658_v28  ;;  %1118 = vmatmul.mubr.f32.gmra.mrb[68].mxu0 %v660_v29  ;;  %v662_v40 = vmax.f32 %v263_v30, 0.0  ;;  %v664_v41 = vmax.f32 %v502_v31, 0.0 }
  0xf3   :  { %v663_v36 = vmax.f32 %v265_v34, 0.0  ;;  %v665_v37 = vmax.f32 %v504_v35, 0.0  ;;  %v268_v38 = vpop.f32.mrb[14].mxu0  ;;  %v507_v39 = vpop.f32.mrb[14].mxu1 }
  0xf4   :  { %v269_v42 = vadd.f32 %v268_v38, %v2275_v13  ;;  %v508_v43 = vadd.f32 %v507_v39, %v2277_v3  ;;  %v270_v44 = vpop.f32.mrb[15].mxu0  ;;  %v509_v45 = vpop.f32.mrb[15].mxu1 }
  0xf5   :  { %v271_v46 = vadd.f32 %v270_v44, %v2279_v14  ;;  %v510_v47 = vadd.f32 %v509_v45, %v2281_v15  ;;  %912 = vmatprep.mubr.f32.mxu1 %v663_v36  ;;  %1122 = vmatprep.mubr.f32.mxu0 %v665_v37 }
  0xf6   :  { %913 = vmatmul.mubr.f32.gmra.mrb[70].mxu1 %v662_v40  ;;  %1123 = vmatmul.mubr.f32.gmra.mrb[70].mxu0 %v664_v41  ;;  %v666_v52 = vmax.f32 %v269_v42, 0.0  ;;  %v668_v53 = vmax.f32 %v508_v43, 0.0 }
  0xf7   :  { %v667_v48 = vmax.f32 %v271_v46, 0.0  ;;  %v669_v49 = vmax.f32 %v510_v47, 0.0  ;;  %v274_v50 = vpop.f32.mrb[16].mxu0  ;;  %v513_v51 = vpop.f32.mrb[16].mxu1 }
  0xf8   :  { %v275_v7 = vadd.f32 %v274_v50, %v2275_v13  ;;  %v514_v54 = vadd.f32 %v513_v51, %v2277_v3  ;;  %v276_v55 = vpop.f32.mrb[17].mxu0  ;;  %v515_v56 = vpop.f32.mrb[17].mxu1 }
  0xf9   :  { %v277_v57 = vadd.f32 %v276_v55, %v2279_v14  ;;  %v516_v58 = vadd.f32 %v515_v56, %v2281_v15  ;;  %917 = vmatprep.mubr.f32.mxu1 %v667_v48  ;;  %1127 = vmatprep.mubr.f32.mxu0 %v669_v49 }
  0xfa   :  { %918 = vmatmul.mubr.f32.gmra.mrb[72].mxu1 %v666_v52  ;;  %1128 = vmatmul.mubr.f32.gmra.mrb[72].mxu0 %v668_v53  ;;  %v670_v63 = vmax.f32 %v275_v7, 0.0  ;;  %v672_v0 = vmax.f32 %v514_v54, 0.0 }
  0xfb   :  { %v671_v59 = vmax.f32 %v277_v57, 0.0  ;;  %v673_v60 = vmax.f32 %v516_v58, 0.0  ;;  %v280_v61 = vpop.f32.mrb[18].mxu0  ;;  %v519_v62 = vpop.f32.mrb[18].mxu1 }
  0xfc   :  { %v281_v1 = vadd.f32 %v280_v61, %v2275_v13  ;;  %v520_v2 = vadd.f32 %v519_v62, %v2277_v3  ;;  %v282_v4 = vpop.f32.mrb[19].mxu0  ;;  %v521_v5 = vpop.f32.mrb[19].mxu1 }
  0xfd   :  { %v283_v6 = vadd.f32 %v282_v4, %v2279_v14  ;;  %v522_v8 = vadd.f32 %v521_v5, %v2281_v15  ;;  %922 = vmatprep.mubr.f32.mxu1 %v671_v59  ;;  %1132 = vmatprep.mubr.f32.mxu0 %v673_v60 }
  0xfe   :  { %923 = vmatmul.mubr.f32.gmra.mrb[74].mxu1 %v670_v63  ;;  %1133 = vmatmul.mubr.f32.gmra.mrb[74].mxu0 %v672_v0  ;;  %v674_v16 = vmax.f32 %v281_v1, 0.0  ;;  %v676_v17 = vmax.f32 %v520_v2, 0.0 }
  0xff   :  { %v675_v9 = vmax.f32 %v283_v6, 0.0  ;;  %v677_v10 = vmax.f32 %v522_v8, 0.0  ;;  %v286_v11 = vpop.f32.mrb[20].mxu0  ;;  %v525_v12 = vpop.f32.mrb[20].mxu1 }
 0x100   :  { %v287_v18 = vadd.f32 %v286_v11, %v2275_v13  ;;  %v526_v19 = vadd.f32 %v525_v12, %v2277_v3  ;;  %v288_v20 = vpop.f32.mrb[21].mxu0  ;;  %v527_v21 = vpop.f32.mrb[21].mxu1 }
 0x101   :  { %v289_v22 = vadd.f32 %v288_v20, %v2279_v14  ;;  %v528_v23 = vadd.f32 %v527_v21, %v2281_v15  ;;  %927 = vmatprep.mubr.f32.mxu1 %v675_v9  ;;  %1137 = vmatprep.mubr.f32.mxu0 %v677_v10 }
 0x102   :  { %928 = vmatmul.mubr.f32.gmra.mrb[76].mxu1 %v674_v16  ;;  %1138 = vmatmul.mubr.f32.gmra.mrb[76].mxu0 %v676_v17  ;;  %v678_v28 = vmax.f32 %v287_v18, 0.0  ;;  %v680_v29 = vmax.f32 %v526_v19, 0.0 }
 0x103   :  { %v679_v24 = vmax.f32 %v289_v22, 0.0  ;;  %v681_v25 = vmax.f32 %v528_v23, 0.0  ;;  %v292_v26 = vpop.f32.mrb[22].mxu0  ;;  %v531_v27 = vpop.f32.mrb[22].mxu1 }
 0x104   :  { %v293_v30 = vadd.f32 %v292_v26, %v2275_v13  ;;  %v532_v31 = vadd.f32 %v531_v27, %v2277_v3  ;;  %v294_v32 = vpop.f32.mrb[23].mxu0  ;;  %v533_v33 = vpop.f32.mrb[23].mxu1 }
 0x105   :  { %v295_v34 = vadd.f32 %v294_v32, %v2279_v14  ;;  %v534_v35 = vadd.f32 %v533_v33, %v2281_v15  ;;  %932 = vmatprep.mubr.f32.mxu1 %v679_v24  ;;  %1142 = vmatprep.mubr.f32.mxu0 %v681_v25 }
 0x106   :  { %933 = vmatmul.mubr.f32.gmra.mrb[78].mxu1 %v678_v28  ;;  %1143 = vmatmul.mubr.f32.gmra.mrb[78].mxu0 %v680_v29  ;;  %v682_v40 = vmax.f32 %v293_v30, 0.0  ;;  %v684_v41 = vmax.f32 %v532_v31, 0.0 }
 0x107   :  { %v683_v36 = vmax.f32 %v295_v34, 0.0  ;;  %v685_v37 = vmax.f32 %v534_v35, 0.0  ;;  %v298_v38 = vpop.f32.mrb[24].mxu0  ;;  %v537_v39 = vpop.f32.mrb[24].mxu1 }
 0x108   :  { %v299_v42 = vadd.f32 %v298_v38, %v2275_v13  ;;  %v538_v43 = vadd.f32 %v537_v39, %v2277_v3  ;;  %v300_v44 = vpop.f32.mrb[25].mxu0  ;;  %v539_v45 = vpop.f32.mrb[25].mxu1 }
 0x109   :  { %v301_v46 = vadd.f32 %v300_v44, %v2279_v14  ;;  %v540_v47 = vadd.f32 %v539_v45, %v2281_v15  ;;  %937 = vmatprep.mubr.f32.mxu1 %v683_v36  ;;  %1147 = vmatprep.mubr.f32.mxu0 %v685_v37 }
 0x10a   :  { %938 = vmatmul.mubr.f32.gmra.mrb[80].mxu1 %v682_v40  ;;  %1148 = vmatmul.mubr.f32.gmra.mrb[80].mxu0 %v684_v41  ;;  %v686_v52 = vmax.f32 %v299_v42, 0.0  ;;  %v688_v53 = vmax.f32 %v538_v43, 0.0 }
 0x10b   :  { %v687_v48 = vmax.f32 %v301_v46, 0.0  ;;  %v689_v49 = vmax.f32 %v540_v47, 0.0  ;;  %v304_v50 = vpop.f32.mrb[26].mxu0  ;;  %v543_v51 = vpop.f32.mrb[26].mxu1 }
 0x10c   :  { %v305_v7 = vadd.f32 %v304_v50, %v2275_v13  ;;  %v544_v54 = vadd.f32 %v543_v51, %v2277_v3  ;;  %v306_v55 = vpop.f32.mrb[27].mxu0  ;;  %v545_v56 = vpop.f32.mrb[27].mxu1 }
 0x10d   :  { %v307_v57 = vadd.f32 %v306_v55, %v2279_v14  ;;  %v546_v58 = vadd.f32 %v545_v56, %v2281_v15  ;;  %942 = vmatprep.mubr.f32.mxu1 %v687_v48  ;;  %1152 = vmatprep.mubr.f32.mxu0 %v689_v49 }
 0x10e   :  { %943 = vmatmul.mubr.f32.gmra.mrb[82].mxu1 %v686_v52  ;;  %1153 = vmatmul.mubr.f32.gmra.mrb[82].mxu0 %v688_v53  ;;  %v690_v63 = vmax.f32 %v305_v7, 0.0  ;;  %v692_v0 = vmax.f32 %v544_v54, 0.0 }
 0x10f   :  { %v691_v59 = vmax.f32 %v307_v57, 0.0  ;;  %v693_v60 = vmax.f32 %v546_v58, 0.0  ;;  %v310_v61 = vpop.f32.mrb[28].mxu0  ;;  %v549_v62 = vpop.f32.mrb[28].mxu1 }
 0x110   :  { %v311_v1 = vadd.f32 %v310_v61, %v2275_v13  ;;  %v550_v2 = vadd.f32 %v549_v62, %v2277_v3  ;;  %v312_v4 = vpop.f32.mrb[29].mxu0  ;;  %v551_v5 = vpop.f32.mrb[29].mxu1 }
 0x111   :  { %v313_v6 = vadd.f32 %v312_v4, %v2279_v14  ;;  %v552_v8 = vadd.f32 %v551_v5, %v2281_v15  ;;  %947 = vmatprep.mubr.f32.mxu1 %v691_v59  ;;  %1157 = vmatprep.mubr.f32.mxu0 %v693_v60 }
 0x112   :  { %948 = vmatmul.mubr.f32.gmra.mrb[84].mxu1 %v690_v63  ;;  %1158 = vmatmul.mubr.f32.gmra.mrb[84].mxu0 %v692_v0  ;;  %v694_v16 = vmax.f32 %v311_v1, 0.0  ;;  %v696_v17 = vmax.f32 %v550_v2, 0.0 }
 0x113   :  { %v695_v9 = vmax.f32 %v313_v6, 0.0  ;;  %v697_v10 = vmax.f32 %v552_v8, 0.0  ;;  %v316_v11 = vpop.f32.mrb[30].mxu0  ;;  %v555_v12 = vpop.f32.mrb[30].mxu1 }
 0x114   :  { %v317_v18 = vadd.f32 %v316_v11, %v2275_v13  ;;  %v556_v19 = vadd.f32 %v555_v12, %v2277_v3  ;;  %v318_v20 = vpop.f32.mrb[31].mxu0  ;;  %v557_v21 = vpop.f32.mrb[31].mxu1 }
 0x115   :  { %v319_v22 = vadd.f32 %v318_v20, %v2279_v14  ;;  %v558_v23 = vadd.f32 %v557_v21, %v2281_v15  ;;  %952 = vmatprep.mubr.f32.mxu1 %v695_v9  ;;  %1162 = vmatprep.mubr.f32.mxu0 %v697_v10 }
 0x116   :  { %953 = vmatmul.mubr.f32.gmra.mrb[86].mxu1 %v694_v16  ;;  %1163 = vmatmul.mubr.f32.gmra.mrb[86].mxu0 %v696_v17  ;;  %v698_v28 = vmax.f32 %v317_v18, 0.0  ;;  %v700_v29 = vmax.f32 %v556_v19, 0.0 }
 0x117   :  { %v699_v24 = vmax.f32 %v319_v22, 0.0  ;;  %v701_v25 = vmax.f32 %v558_v23, 0.0  ;;  %v322_v26 = vpop.f32.mrb[32].mxu0  ;;  %v561_v27 = vpop.f32.mrb[32].mxu1 }
 0x118   :  { %v323_v30 = vadd.f32 %v322_v26, %v2275_v13  ;;  %v562_v31 = vadd.f32 %v561_v27, %v2277_v3  ;;  %v324_v32 = vpop.f32.mrb[33].mxu0  ;;  %v563_v33 = vpop.f32.mrb[33].mxu1 }
 0x119   :  { %v325_v34 = vadd.f32 %v324_v32, %v2279_v14  ;;  %v564_v35 = vadd.f32 %v563_v33, %v2281_v15  ;;  %957 = vmatprep.mubr.f32.mxu1 %v699_v24  ;;  %1167 = vmatprep.mubr.f32.mxu0 %v701_v25 }
 0x11a   :  { %958 = vmatmul.mubr.f32.gmra.mrb[88].mxu1 %v698_v28  ;;  %1168 = vmatmul.mubr.f32.gmra.mrb[88].mxu0 %v700_v29  ;;  %v702_v40 = vmax.f32 %v323_v30, 0.0  ;;  %v704_v41 = vmax.f32 %v562_v31, 0.0 }
 0x11b   :  { %v703_v36 = vmax.f32 %v325_v34, 0.0  ;;  %v705_v37 = vmax.f32 %v564_v35, 0.0  ;;  %v328_v38 = vpop.f32.mrb[34].mxu0  ;;  %v567_v39 = vpop.f32.mrb[34].mxu1 }
 0x11c   :  { %v329_v42 = vadd.f32 %v328_v38, %v2275_v13  ;;  %v568_v43 = vadd.f32 %v567_v39, %v2277_v3  ;;  %v330_v44 = vpop.f32.mrb[35].mxu0  ;;  %v569_v45 = vpop.f32.mrb[35].mxu1 }
 0x11d   :  { %v331_v46 = vadd.f32 %v330_v44, %v2279_v14  ;;  %v570_v47 = vadd.f32 %v569_v45, %v2281_v15  ;;  %962 = vmatprep.mubr.f32.mxu1 %v703_v36  ;;  %1172 = vmatprep.mubr.f32.mxu0 %v705_v37 }
 0x11e   :  { %963 = vmatmul.mubr.f32.gmra.mrb[90].mxu1 %v702_v40  ;;  %1173 = vmatmul.mubr.f32.gmra.mrb[90].mxu0 %v704_v41  ;;  %v706_v52 = vmax.f32 %v329_v42, 0.0  ;;  %v708_v53 = vmax.f32 %v568_v43, 0.0 }
 0x11f   :  { %v707_v48 = vmax.f32 %v331_v46, 0.0  ;;  %v709_v49 = vmax.f32 %v570_v47, 0.0  ;;  %v334_v50 = vpop.f32.mrb[36].mxu0  ;;  %v573_v51 = vpop.f32.mrb[36].mxu1 }
 0x120   :  { %v335_v7 = vadd.f32 %v334_v50, %v2275_v13  ;;  %v574_v54 = vadd.f32 %v573_v51, %v2277_v3  ;;  %v336_v55 = vpop.f32.mrb[37].mxu0  ;;  %v575_v56 = vpop.f32.mrb[37].mxu1 }
 0x121   :  { %v337_v57 = vadd.f32 %v336_v55, %v2279_v14  ;;  %v576_v58 = vadd.f32 %v575_v56, %v2281_v15  ;;  %967 = vmatprep.mubr.f32.mxu1 %v707_v48  ;;  %1177 = vmatprep.mubr.f32.mxu0 %v709_v49 }
 0x122   :  { %968 = vmatmul.mubr.f32.gmra.mrb[92].mxu1 %v706_v52  ;;  %1178 = vmatmul.mubr.f32.gmra.mrb[92].mxu0 %v708_v53  ;;  %v710_v63 = vmax.f32 %v335_v7, 0.0  ;;  %v712_v0 = vmax.f32 %v574_v54, 0.0 }
 0x123   :  { %v711_v59 = vmax.f32 %v337_v57, 0.0  ;;  %v713_v60 = vmax.f32 %v576_v58, 0.0  ;;  %v340_v61 = vpop.f32.mrb[38].mxu0  ;;  %v579_v62 = vpop.f32.mrb[38].mxu1 }
 0x124   :  { %v341_v1 = vadd.f32 %v340_v61, %v2275_v13  ;;  %v580_v2 = vadd.f32 %v579_v62, %v2277_v3  ;;  %v342_v4 = vpop.f32.mrb[39].mxu0  ;;  %v581_v5 = vpop.f32.mrb[39].mxu1 }
 0x125   :  { %v343_v6 = vadd.f32 %v342_v4, %v2279_v14  ;;  %v582_v8 = vadd.f32 %v581_v5, %v2281_v15  ;;  %972 = vmatprep.mubr.f32.mxu1 %v711_v59  ;;  %1182 = vmatprep.mubr.f32.mxu0 %v713_v60 }
 0x126   :  { %973 = vmatmul.mubr.f32.gmra.mrb[94].mxu1 %v710_v63  ;;  %1183 = vmatmul.mubr.f32.gmra.mrb[94].mxu0 %v712_v0  ;;  %v714_v16 = vmax.f32 %v341_v1, 0.0  ;;  %v716_v17 = vmax.f32 %v580_v2, 0.0 }
 0x127   :  { %v715_v9 = vmax.f32 %v343_v6, 0.0  ;;  %v717_v10 = vmax.f32 %v582_v8, 0.0  ;;  %v346_v11 = vpop.f32.mrb[40].mxu0  ;;  %v585_v12 = vpop.f32.mrb[40].mxu1 }
 0x128   :  { %v347_v18 = vadd.f32 %v346_v11, %v2275_v13  ;;  %v586_v19 = vadd.f32 %v585_v12, %v2277_v3  ;;  %v348_v20 = vpop.f32.mrb[41].mxu0  ;;  %v587_v21 = vpop.f32.mrb[41].mxu1 }
 0x129   :  { %v349_v22 = vadd.f32 %v348_v20, %v2279_v14  ;;  %v588_v23 = vadd.f32 %v587_v21, %v2281_v15  ;;  %977 = vmatprep.mubr.f32.mxu1 %v715_v9  ;;  %1187 = vmatprep.mubr.f32.mxu0 %v717_v10 }
 0x12a   :  { %978 = vmatmul.mubr.f32.gmra.mrb[96].mxu1 %v714_v16  ;;  %1188 = vmatmul.mubr.f32.gmra.mrb[96].mxu0 %v716_v17  ;;  %v718_v28 = vmax.f32 %v347_v18, 0.0  ;;  %v720_v29 = vmax.f32 %v586_v19, 0.0 }
 0x12b   :  { %v719_v24 = vmax.f32 %v349_v22, 0.0  ;;  %v721_v25 = vmax.f32 %v588_v23, 0.0  ;;  %v352_v26 = vpop.f32.mrb[42].mxu0  ;;  %v591_v27 = vpop.f32.mrb[42].mxu1 }
 0x12c   :  { %v353_v30 = vadd.f32 %v352_v26, %v2275_v13  ;;  %v592_v31 = vadd.f32 %v591_v27, %v2277_v3  ;;  %v354_v32 = vpop.f32.mrb[43].mxu0  ;;  %v593_v33 = vpop.f32.mrb[43].mxu1 }
 0x12d   :  { %v355_v34 = vadd.f32 %v354_v32, %v2279_v14  ;;  %v594_v35 = vadd.f32 %v593_v33, %v2281_v15  ;;  %982 = vmatprep.mubr.f32.mxu1 %v719_v24  ;;  %1192 = vmatprep.mubr.f32.mxu0 %v721_v25 }
 0x12e   :  { %983 = vmatmul.mubr.f32.gmra.mrb[98].mxu1 %v718_v28  ;;  %1193 = vmatmul.mubr.f32.gmra.mrb[98].mxu0 %v720_v29  ;;  %v722_v40 = vmax.f32 %v353_v30, 0.0  ;;  %v724_v41 = vmax.f32 %v592_v31, 0.0 }
 0x12f   :  { %v723_v36 = vmax.f32 %v355_v34, 0.0  ;;  %v725_v37 = vmax.f32 %v594_v35, 0.0  ;;  %v358_v38 = vpop.f32.mrb[44].mxu0  ;;  %v597_v39 = vpop.f32.mrb[44].mxu1 }
 0x130   :  { %v359_v42 = vadd.f32 %v358_v38, %v2275_v13  ;;  %v598_v43 = vadd.f32 %v597_v39, %v2277_v3  ;;  %v360_v44 = vpop.f32.mrb[45].mxu0  ;;  %v599_v45 = vpop.f32.mrb[45].mxu1 }
 0x131   :  { %v361_v46 = vadd.f32 %v360_v44, %v2279_v14  ;;  %v600_v47 = vadd.f32 %v599_v45, %v2281_v15  ;;  %987 = vmatprep.mubr.f32.mxu1 %v723_v36  ;;  %1197 = vmatprep.mubr.f32.mxu0 %v725_v37 }
 0x132   :  { %988 = vmatmul.mubr.f32.gmra.mrb[100].mxu1 %v722_v40  ;;  %1198 = vmatmul.mubr.f32.gmra.mrb[100].mxu0 %v724_v41  ;;  %v726_v52 = vmax.f32 %v359_v42, 0.0  ;;  %v728_v53 = vmax.f32 %v598_v43, 0.0 }
 0x133   :  { %v727_v48 = vmax.f32 %v361_v46, 0.0  ;;  %v729_v49 = vmax.f32 %v600_v47, 0.0  ;;  %v364_v50 = vpop.f32.mrb[46].mxu0  ;;  %v603_v51 = vpop.f32.mrb[46].mxu1 }
 0x134   :  { %v365_v7 = vadd.f32 %v364_v50, %v2275_v13  ;;  %v604_v54 = vadd.f32 %v603_v51, %v2277_v3  ;;  %v366_v55 = vpop.f32.mrb[47].mxu0  ;;  %v605_v56 = vpop.f32.mrb[47].mxu1 }
 0x135   :  { %v367_v57 = vadd.f32 %v366_v55, %v2279_v14  ;;  %v606_v58 = vadd.f32 %v605_v56, %v2281_v15  ;;  %992 = vmatprep.mubr.f32.mxu1 %v727_v48  ;;  %1202 = vmatprep.mubr.f32.mxu0 %v729_v49 }
 0x136   :  { %993 = vmatmul.mubr.f32.gmra.mrb[102].mxu1 %v726_v52  ;;  %1203 = vmatmul.mubr.f32.gmra.mrb[102].mxu0 %v728_v53  ;;  %v730_v63 = vmax.f32 %v365_v7, 0.0  ;;  %v732_v0 = vmax.f32 %v604_v54, 0.0 }
 0x137   :  { %v731_v59 = vmax.f32 %v367_v57, 0.0  ;;  %v733_v60 = vmax.f32 %v606_v58, 0.0  ;;  %v370_v61 = vpop.f32.mrb[48].mxu0  ;;  %v609_v62 = vpop.f32.mrb[48].mxu1 }
 0x138   :  { %v371_v1 = vadd.f32 %v370_v61, %v2275_v13  ;;  %v610_v2 = vadd.f32 %v609_v62, %v2277_v3  ;;  %v372_v4 = vpop.f32.mrb[49].mxu0  ;;  %v611_v5 = vpop.f32.mrb[49].mxu1 }
 0x139   :  { %v373_v6 = vadd.f32 %v372_v4, %v2279_v14  ;;  %v612_v8 = vadd.f32 %v611_v5, %v2281_v15  ;;  %997 = vmatprep.mubr.f32.mxu1 %v731_v59  ;;  %1207 = vmatprep.mubr.f32.mxu0 %v733_v60 }
 0x13a   :  { %998 = vmatmul.mubr.f32.gmra.mrb[104].mxu1 %v730_v63  ;;  %1208 = vmatmul.mubr.f32.gmra.mrb[104].mxu0 %v732_v0  ;;  %v734_v16 = vmax.f32 %v371_v1, 0.0  ;;  %v736_v17 = vmax.f32 %v610_v2, 0.0 }
 0x13b   :  { %v735_v9 = vmax.f32 %v373_v6, 0.0  ;;  %v737_v10 = vmax.f32 %v612_v8, 0.0  ;;  %v376_v11 = vpop.f32.mrb[50].mxu0  ;;  %v615_v12 = vpop.f32.mrb[50].mxu1 }
 0x13c   :  { %v377_v18 = vadd.f32 %v376_v11, %v2275_v13  ;;  %v616_v19 = vadd.f32 %v615_v12, %v2277_v3  ;;  %v378_v20 = vpop.f32.mrb[51].mxu0  ;;  %v617_v21 = vpop.f32.mrb[51].mxu1 }
 0x13d   :  { %v379_v22 = vadd.f32 %v378_v20, %v2279_v14  ;;  %v618_v23 = vadd.f32 %v617_v21, %v2281_v15  ;;  %1002 = vmatprep.mubr.f32.mxu1 %v735_v9  ;;  %1212 = vmatprep.mubr.f32.mxu0 %v737_v10 }
 0x13e   :  { %1003 = vmatmul.mubr.f32.gmra.mrb[106].mxu1 %v734_v16  ;;  %1213 = vmatmul.mubr.f32.gmra.mrb[106].mxu0 %v736_v17  ;;  %v738_v28 = vmax.f32 %v377_v18, 0.0  ;;  %v740_v29 = vmax.f32 %v616_v19, 0.0 }
 0x13f   :  { %v739_v24 = vmax.f32 %v379_v22, 0.0  ;;  %v741_v25 = vmax.f32 %v618_v23, 0.0  ;;  %v382_v26 = vpop.f32.mrb[52].mxu0  ;;  %v621_v27 = vpop.f32.mrb[52].mxu1 }
 0x140   :  { %v383_v30 = vadd.f32 %v382_v26, %v2275_v13  ;;  %v622_v31 = vadd.f32 %v621_v27, %v2277_v3  ;;  %v384_v32 = vpop.f32.mrb[53].mxu0  ;;  %v623_v33 = vpop.f32.mrb[53].mxu1 }
 0x141   :  { %v385_v34 = vadd.f32 %v384_v32, %v2279_v14  ;;  %v624_v35 = vadd.f32 %v623_v33, %v2281_v15  ;;  %1007 = vmatprep.mubr.f32.mxu1 %v739_v24  ;;  %1217 = vmatprep.mubr.f32.mxu0 %v741_v25 }
 0x142   :  { %1008 = vmatmul.mubr.f32.gmra.mrb[108].mxu1 %v738_v28  ;;  %1218 = vmatmul.mubr.f32.gmra.mrb[108].mxu0 %v740_v29  ;;  %v742_v40 = vmax.f32 %v383_v30, 0.0  ;;  %v744_v41 = vmax.f32 %v622_v31, 0.0 }
 0x143   :  { %v743_v36 = vmax.f32 %v385_v34, 0.0  ;;  %v745_v37 = vmax.f32 %v624_v35, 0.0  ;;  %v388_v38 = vpop.f32.mrb[54].mxu0  ;;  %v627_v39 = vpop.f32.mrb[54].mxu1 }
 0x144   :  { %v389_v42 = vadd.f32 %v388_v38, %v2275_v13  ;;  %v628_v43 = vadd.f32 %v627_v39, %v2277_v3  ;;  %v390_v44 = vpop.f32.mrb[55].mxu0  ;;  %v629_v45 = vpop.f32.mrb[55].mxu1 }
 0x145   :  { %v391_v46 = vadd.f32 %v390_v44, %v2279_v14  ;;  %v630_v47 = vadd.f32 %v629_v45, %v2281_v15  ;;  %1012 = vmatprep.mubr.f32.mxu1 %v743_v36  ;;  %1222 = vmatprep.mubr.f32.mxu0 %v745_v37 }
 0x146   :  { %1013 = vmatmul.mubr.f32.gmra.mrb[110].mxu1 %v742_v40  ;;  %1223 = vmatmul.mubr.f32.gmra.mrb[110].mxu0 %v744_v41  ;;  %v746_v52 = vmax.f32 %v389_v42, 0.0  ;;  %v748_v53 = vmax.f32 %v628_v43, 0.0 }
 0x147   :  { %v747_v48 = vmax.f32 %v391_v46, 0.0  ;;  %v749_v49 = vmax.f32 %v630_v47, 0.0  ;;  %v394_v50 = vpop.f32.mrb[56].mxu0  ;;  %v633_v51 = vpop.f32.mrb[56].mxu1 }
 0x148   :  { %v395_v7 = vadd.f32 %v394_v50, %v2275_v13  ;;  %v634_v54 = vadd.f32 %v633_v51, %v2277_v3  ;;  %v396_v55 = vpop.f32.mrb[57].mxu0  ;;  %v635_v56 = vpop.f32.mrb[57].mxu1 }
 0x149   :  { %v397_v57 = vadd.f32 %v396_v55, %v2279_v14  ;;  %v636_v58 = vadd.f32 %v635_v56, %v2281_v15  ;;  %1017 = vmatprep.mubr.f32.mxu1 %v747_v48  ;;  %1227 = vmatprep.mubr.f32.mxu0 %v749_v49 }
 0x14a   :  { %1018 = vmatmul.mubr.f32.gmra.mrb[112].mxu1 %v746_v52  ;;  %1228 = vmatmul.mubr.f32.gmra.mrb[112].mxu0 %v748_v53  ;;  %v750_v61 = vmax.f32 %v395_v7, 0.0  ;;  %v752_v62 = vmax.f32 %v634_v54, 0.0 }
 0x14b   :  { %v751_v59 = vmax.f32 %v397_v57, 0.0  ;;  %v753_v60 = vmax.f32 %v636_v58, 0.0 }
 0x14d   :  { %1022 = vmatprep.mubr.f32.mxu1 %v751_v59  ;;  %1232 = vmatprep.mubr.f32.mxu0 %v753_v60 }
 0x14e   :  { %1023 = vmatmul.mubr.f32.gmra.mrb[114].mxu1 %v750_v61  ;;  %1233 = vmatmul.mubr.f32.gmra.mrb[114].mxu0 %v752_v62 }
 0x1b1   :  { %v884_v13 = vpop.f32.mrb[58].mxu1  ;;  %v1094_v3 = vpop.f32.mrb[58].mxu0 }
 0x1b2   :  { %v1095_v63 = vadd.f32 %v1094_v3, %v884_v13  ;;  %v886_v0 = vpop.f32.mrb[59].mxu1  ;;  %v1096_v1 = vpop.f32.mrb[59].mxu0 }
 0x1b4   :  { %v1534_v14 = vmul.f32 -1.442695, %v1095_v63 }
 0x1b5   :  { %v889_v2 = vpop.f32.mrb[60].mxu1  ;;  %v1099_v15 = vpop.f32.mrb[60].mxu0 }
 0x1b6   :  { %1690 = vpow2.f32 %v1534_v14  ;;  %v1100_v4 = vadd.f32 %v1099_v15, %v889_v2  ;;  %v891_v5 = vpop.f32.mrb[61].mxu1  ;;  %v1101_v6 = vpop.f32.mrb[61].mxu0 }
 0x1b8   :  { %v1535_v8 = vmul.f32 -1.442695, %v1100_v4 }
 0x1b9   :  { %v894_v9 = vpop.f32.mrb[62].mxu1  ;;  %v1104_v10 = vpop.f32.mrb[62].mxu0 }
 0x1ba   :  { %1692 = vpow2.f32 %v1535_v8  ;;  %v1105_v11 = vadd.f32 %v1104_v10, %v894_v9  ;;  %v896_v12 = vpop.f32.mrb[63].mxu1  ;;  %v1106_v16 = vpop.f32.mrb[63].mxu0 }
 0x1bc   :  { %v1536_v17 = vmul.f32 -1.442695, %v1105_v11 }
 0x1bd   :  { %v899_v18 = vpop.f32.mrb[64].mxu1  ;;  %v1109_v19 = vpop.f32.mrb[64].mxu0 }
 0x1be   :  { %1694 = vpow2.f32 %v1536_v17  ;;  %v1110_v20 = vadd.f32 %v1109_v19, %v899_v18  ;;  %v901_v21 = vpop.f32.mrb[65].mxu1  ;;  %v1111_v22 = vpop.f32.mrb[65].mxu0 }
 0x1c0   :  { %v1691_v23 = vpop.eup %1690  ;;  %v1537_v24 = vmul.f32 -1.442695, %v1110_v20 }
 0x1c1   :  { %v1325_v25 = vadd.f32 1.0, %v1691_v23  ;;  %v904_v26 = vpop.f32.mrb[66].mxu1  ;;  %v1114_v27 = vpop.f32.mrb[66].mxu0 }
 0x1c2   :  { %1696 = vpow2.f32 %v1537_v24  ;;  %v1115_v28 = vadd.f32 %v1114_v27, %v904_v26  ;;  %v906_v29 = vpop.f32.mrb[67].mxu1  ;;  %v1116_v30 = vpop.f32.mrb[67].mxu0 }
 0x1c3   :  { %1698 = vrcp.f32 %v1325_v25 }
 0x1c4   :  { %v1693_v31 = vpop.eup %1692  ;;  %v1538_v32 = vmul.f32 -1.442695, %v1115_v28 }
 0x1c5   :  { %v1326_v33 = vadd.f32 1.0, %v1693_v31  ;;  %v909_v34 = vpop.f32.mrb[68].mxu1  ;;  %v1119_v35 = vpop.f32.mrb[68].mxu0 }
 0x1c6   :  { %1700 = vpow2.f32 %v1538_v32  ;;  %v1120_v36 = vadd.f32 %v1119_v35, %v909_v34  ;;  %v911_v37 = vpop.f32.mrb[69].mxu1  ;;  %v1121_v38 = vpop.f32.mrb[69].mxu0 }
 0x1c7   :  { %1702 = vrcp.f32 %v1326_v33 }
 0x1c8   :  { %v1695_v39 = vpop.eup %1694  ;;  %v1539_v40 = vmul.f32 -1.442695, %v1120_v36 }
 0x1c9   :  { %v1327_v41 = vadd.f32 1.0, %v1695_v39  ;;  %v914_v42 = vpop.f32.mrb[70].mxu1  ;;  %v1124_v43 = vpop.f32.mrb[70].mxu0 }
 0x1ca   :  { %1704 = vpow2.f32 %v1539_v40  ;;  %v1125_v44 = vadd.f32 %v1124_v43, %v914_v42  ;;  %v916_v45 = vpop.f32.mrb[71].mxu1  ;;  %v1126_v46 = vpop.f32.mrb[71].mxu0 }
 0x1cb   :  { %1706 = vrcp.f32 %v1327_v41 }
 0x1cc   :  { %v1697_v47 = vpop.eup %1696  ;;  %v1540_v48 = vmul.f32 -1.442695, %v1125_v44 }
 0x1cd   :  { %v1699_v49 = vpop.eup %1698  ;;  %v1328_v50 = vadd.f32 1.0, %v1697_v47  ;;  %v919_v51 = vpop.f32.mrb[72].mxu1 }
 0x1ce   :  { %v1129_v52 = vpop.f32.mrb[72].mxu0  ;;  %v1412_v53 = vmul.f32 16.0, %v1699_v49  ;;  %1708 = vpow2.f32 %v1540_v48  ;;  %v921_v54 = vpop.f32.mrb[73].mxu1 }
 0x1cf   :  { %v1130_v7 = vadd.f32 %v1129_v52, %v919_v51  ;;  %v1131_v55 = vpop.f32.mrb[73].mxu0  ;;  %1710 = vrcp.f32 %v1328_v50 }
 0x1d0   :  { %v1701_v56 = vpop.eup %1700  ;;  %1442 = vst.msk [vmem:[%s2518_s4] sm:$0xff] %vm1441_vm1, %v1412_v53 }
 0x1d1   :  { %v1541_v57 = vmul.f32 -1.442695, %v1130_v7  ;;  %v1703_v58 = vpop.eup %1702  ;;  %v1329_v59 = vadd.f32 1.0, %v1701_v56  ;;  %v924_v60 = vpop.f32.mrb[74].mxu1 }
 0x1d2   :  { %v1134_v61 = vpop.f32.mrb[74].mxu0  ;;  %v1413_v62 = vmul.f32 16.0, %v1703_v58  ;;  %v926_v3 = vpop.f32.mrb[75].mxu1 }
 0x1d3   :  { %1712 = vpow2.f32 %v1541_v57  ;;  %v1135_v13 = vadd.f32 %v1134_v61, %v924_v60  ;;  %v1136_v63 = vpop.f32.mrb[75].mxu0 }
 0x1d4   :  { %1714 = vrcp.f32 %v1329_v59  ;;  %v1705_v0 = vpop.eup %1704  ;;  %1443 = vst.msk [vmem:[%s2518_s4 + $0x8] sm:$0xff] %vm1441_vm1, %v1413_v62 }
 0x1d5   :  { %v1542_v1 = vmul.f32 -1.442695, %v1135_v13  ;;  %v1707_v14 = vpop.eup %1706  ;;  %v1330_v2 = vadd.f32 1.0, %v1705_v0  ;;  %v929_v15 = vpop.f32.mrb[76].mxu1 }
 0x1d6   :  { %v1139_v4 = vpop.f32.mrb[76].mxu0  ;;  %v1414_v5 = vmul.f32 16.0, %v1707_v14  ;;  %v931_v8 = vpop.f32.mrb[77].mxu1 }
 0x1d7   :  { %1716 = vpow2.f32 %v1542_v1  ;;  %v1140_v6 = vadd.f32 %v1139_v4, %v929_v15  ;;  %v1141_v9 = vpop.f32.mrb[77].mxu0 }
 0x1d8   :  { %1718 = vrcp.f32 %v1330_v2  ;;  %v1709_v10 = vpop.eup %1708  ;;  %1444 = vst.msk [vmem:[%s2518_s4 + $0x10] sm:$0xff] %vm1441_vm1, %v1414_v5 }
 0x1d9   :  { %v1543_v11 = vmul.f32 -1.442695, %v1140_v6  ;;  %v1711_v12 = vpop.eup %1710  ;;  %v1331_v16 = vadd.f32 1.0, %v1709_v10  ;;  %v934_v17 = vpop.f32.mrb[78].mxu1 }
 0x1da   :  { %v1144_v18 = vpop.f32.mrb[78].mxu0  ;;  %v1415_v19 = vmul.f32 16.0, %v1711_v12  ;;  %v936_v21 = vpop.f32.mrb[79].mxu1 }
 0x1db   :  { %1720 = vpow2.f32 %v1543_v11  ;;  %v1145_v20 = vadd.f32 %v1144_v18, %v934_v17  ;;  %v1146_v22 = vpop.f32.mrb[79].mxu0 }
 0x1dc   :  { %1722 = vrcp.f32 %v1331_v16  ;;  %1445 = vst.msk [vmem:[%s2518_s4 + $0x18] sm:$0xff] %vm1441_vm1, %v1415_v19 }
 0x1dd   :  { %v1713_v23 = vpop.eup %1712  ;;  %v1544_v24 = vmul.f32 -1.442695, %v1145_v20  ;;  %v939_v27 = vpop.f32.mrb[80].mxu1 }
 0x1de   :  { %v1715_v25 = vpop.eup %1714  ;;  %v1332_v26 = vadd.f32 1.0, %v1713_v23  ;;  %v1149_v28 = vpop.f32.mrb[80].mxu0 }
 0x1df   :  { %v1416_v29 = vmul.f32 16.0, %v1715_v25  ;;  %1724 = vpow2.f32 %v1544_v24  ;;  %v1150_v30 = vadd.f32 %v1149_v28, %v939_v27  ;;  %v941_v31 = vpop.f32.mrb[81].mxu1  ;;  %v1151_v32 = vpop.f32.mrb[81].mxu0 }
 0x1e0   :  { %1726 = vrcp.f32 %v1332_v26 }
 0x1e1   :  { %v1717_v33 = vpop.eup %1716  ;;  %1446 = vst.msk [vmem:[%s2518_s4 + $0x20] sm:$0xff] %vm1441_vm1, %v1416_v29  ;;  %v1545_v34 = vmul.f32 -1.442695, %v1150_v30  ;;  %v944_v37 = vpop.f32.mrb[82].mxu1 }
 0x1e2   :  { %v1719_v35 = vpop.eup %1718  ;;  %v1333_v36 = vadd.f32 1.0, %v1717_v33  ;;  %v1154_v38 = vpop.f32.mrb[82].mxu0 }
 0x1e3   :  { %v1417_v39 = vmul.f32 16.0, %v1719_v35  ;;  %1728 = vpow2.f32 %v1545_v34  ;;  %v1155_v40 = vadd.f32 %v1154_v38, %v944_v37  ;;  %v946_v41 = vpop.f32.mrb[83].mxu1  ;;  %v1156_v42 = vpop.f32.mrb[83].mxu0 }
 0x1e4   :  { %1730 = vrcp.f32 %v1333_v36 }
 0x1e5   :  { %v1721_v43 = vpop.eup %1720  ;;  %1447 = vst.msk [vmem:[%s2518_s4 + $0x28] sm:$0xff] %vm1441_vm1, %v1417_v39  ;;  %v1546_v44 = vmul.f32 -1.442695, %v1155_v40  ;;  %v949_v47 = vpop.f32.mrb[84].mxu1 }
 0x1e6   :  { %v1723_v45 = vpop.eup %1722  ;;  %v1334_v46 = vadd.f32 1.0, %v1721_v43  ;;  %v1159_v48 = vpop.f32.mrb[84].mxu0 }
 0x1e7   :  { %v1418_v49 = vmul.f32 16.0, %v1723_v45  ;;  %1732 = vpow2.f32 %v1546_v44  ;;  %v1160_v50 = vadd.f32 %v1159_v48, %v949_v47  ;;  %v951_v51 = vpop.f32.mrb[85].mxu1  ;;  %v1161_v52 = vpop.f32.mrb[85].mxu0 }
 0x1e8   :  { %1734 = vrcp.f32 %v1334_v46 }
 0x1e9   :  { %v1725_v53 = vpop.eup %1724  ;;  %1448 = vst.msk [vmem:[%s2518_s4 + $0x30] sm:$0xff] %vm1441_vm1, %v1418_v49  ;;  %v1547_v7 = vmul.f32 -1.442695, %v1160_v50  ;;  %v954_v56 = vpop.f32.mrb[86].mxu1 }
 0x1ea   :  { %v1727_v54 = vpop.eup %1726  ;;  %v1335_v55 = vadd.f32 1.0, %v1725_v53  ;;  %v1164_v57 = vpop.f32.mrb[86].mxu0 }
 0x1eb   :  { %v1419_v58 = vmul.f32 16.0, %v1727_v54  ;;  %1736 = vpow2.f32 %v1547_v7  ;;  %v1165_v59 = vadd.f32 %v1164_v57, %v954_v56  ;;  %v956_v60 = vpop.f32.mrb[87].mxu1  ;;  %v1166_v61 = vpop.f32.mrb[87].mxu0 }
 0x1ec   :  { %1738 = vrcp.f32 %v1335_v55 }
 0x1ed   :  { %v1729_v62 = vpop.eup %1728  ;;  %1449 = vst.msk [vmem:[%s2518_s4 + $0x38] sm:$0xff] %vm1441_vm1, %v1419_v58  ;;  %v1548_v13 = vmul.f32 -1.442695, %v1165_v59  ;;  %v959_v0 = vpop.f32.mrb[88].mxu1 }
 0x1ee   :  { %v1731_v3 = vpop.eup %1730  ;;  %v1336_v63 = vadd.f32 1.0, %v1729_v62  ;;  %v1169_v1 = vpop.f32.mrb[88].mxu0 }
 0x1ef   :  { %v1420_v14 = vmul.f32 16.0, %v1731_v3  ;;  %1740 = vpow2.f32 %v1548_v13  ;;  %v1170_v2 = vadd.f32 %v1169_v1, %v959_v0  ;;  %v961_v15 = vpop.f32.mrb[89].mxu1  ;;  %v1171_v4 = vpop.f32.mrb[89].mxu0 }
 0x1f0   :  { %1742 = vrcp.f32 %v1336_v63 }
 0x1f1   :  { %v1733_v5 = vpop.eup %1732  ;;  %1450 = vst.msk [vmem:[%s2518_s4 + $0x40] sm:$0xff] %vm1441_vm1, %v1420_v14  ;;  %v1549_v6 = vmul.f32 -1.442695, %v1170_v2  ;;  %v964_v10 = vpop.f32.mrb[90].mxu1 }
 0x1f2   :  { %v1735_v8 = vpop.eup %1734  ;;  %v1337_v9 = vadd.f32 1.0, %v1733_v5  ;;  %v1174_v11 = vpop.f32.mrb[90].mxu0 }
 0x1f3   :  { %v1421_v12 = vmul.f32 16.0, %v1735_v8  ;;  %1744 = vpow2.f32 %v1549_v6  ;;  %v1175_v16 = vadd.f32 %v1174_v11, %v964_v10  ;;  %v966_v17 = vpop.f32.mrb[91].mxu1  ;;  %v1176_v18 = vpop.f32.mrb[91].mxu0 }
 0x1f4   :  { %1746 = vrcp.f32 %v1337_v9 }
 0x1f5   :  { %v1737_v19 = vpop.eup %1736  ;;  %1451 = vst.msk [vmem:[%s2518_s4 + $0x48] sm:$0xff] %vm1441_vm1, %v1421_v12  ;;  %v1550_v20 = vmul.f32 -1.442695, %v1175_v16  ;;  %v969_v23 = vpop.f32.mrb[92].mxu1 }
 0x1f6   :  { %v1739_v21 = vpop.eup %1738  ;;  %v1338_v22 = vadd.f32 1.0, %v1737_v19  ;;  %v1179_v24 = vpop.f32.mrb[92].mxu0 }
 0x1f7   :  { %v1422_v25 = vmul.f32 16.0, %v1739_v21  ;;  %1748 = vpow2.f32 %v1550_v20  ;;  %v1180_v26 = vadd.f32 %v1179_v24, %v969_v23  ;;  %v971_v27 = vpop.f32.mrb[93].mxu1  ;;  %v1181_v28 = vpop.f32.mrb[93].mxu0 }
 0x1f8   :  { %1750 = vrcp.f32 %v1338_v22 }
 0x1f9   :  { %v1741_v29 = vpop.eup %1740  ;;  %1452 = vst.msk [vmem:[%s2518_s4 + $0x50] sm:$0xff] %vm1441_vm1, %v1422_v25  ;;  %v1551_v30 = vmul.f32 -1.442695, %v1180_v26  ;;  %v974_v33 = vpop.f32.mrb[94].mxu1 }
 0x1fa   :  { %v1743_v31 = vpop.eup %1742  ;;  %v1339_v32 = vadd.f32 1.0, %v1741_v29  ;;  %v1184_v34 = vpop.f32.mrb[94].mxu0 }
 0x1fb   :  { %v1423_v35 = vmul.f32 16.0, %v1743_v31  ;;  %1752 = vpow2.f32 %v1551_v30  ;;  %v1185_v36 = vadd.f32 %v1184_v34, %v974_v33  ;;  %v976_v37 = vpop.f32.mrb[95].mxu1  ;;  %v1186_v38 = vpop.f32.mrb[95].mxu0 }
 0x1fc   :  { %1754 = vrcp.f32 %v1339_v32 }
 0x1fd   :  { %v1745_v39 = vpop.eup %1744  ;;  %1453 = vst.msk [vmem:[%s2518_s4 + $0x58] sm:$0xff] %vm1441_vm1, %v1423_v35  ;;  %v1552_v40 = vmul.f32 -1.442695, %v1185_v36  ;;  %v979_v43 = vpop.f32.mrb[96].mxu1 }
 0x1fe   :  { %v1747_v41 = vpop.eup %1746  ;;  %v1340_v42 = vadd.f32 1.0, %v1745_v39  ;;  %v1189_v44 = vpop.f32.mrb[96].mxu0 }
 0x1ff   :  { %v1424_v45 = vmul.f32 16.0, %v1747_v41  ;;  %1756 = vpow2.f32 %v1552_v40  ;;  %v1190_v46 = vadd.f32 %v1189_v44, %v979_v43  ;;  %v981_v47 = vpop.f32.mrb[97].mxu1  ;;  %v1191_v48 = vpop.f32.mrb[97].mxu0 }
 0x200   :  { %1758 = vrcp.f32 %v1340_v42 }
 0x201   :  { %v1749_v49 = vpop.eup %1748  ;;  %1454 = vst.msk [vmem:[%s2518_s4 + $0x60] sm:$0xff] %vm1441_vm1, %v1424_v45  ;;  %v1553_v50 = vmul.f32 -1.442695, %v1190_v46  ;;  %v984_v53 = vpop.f32.mrb[98].mxu1 }
 0x202   :  { %v1751_v51 = vpop.eup %1750  ;;  %v1341_v52 = vadd.f32 1.0, %v1749_v49  ;;  %v1194_v7 = vpop.f32.mrb[98].mxu0 }
 0x203   :  { %v1425_v54 = vmul.f32 16.0, %v1751_v51  ;;  %1760 = vpow2.f32 %v1553_v50  ;;  %v1195_v55 = vadd.f32 %v1194_v7, %v984_v53  ;;  %v986_v56 = vpop.f32.mrb[99].mxu1  ;;  %v1196_v57 = vpop.f32.mrb[99].mxu0 }
 0x204   :  { %1762 = vrcp.f32 %v1341_v52 }
 0x205   :  { %v1753_v58 = vpop.eup %1752  ;;  %1455 = vst.msk [vmem:[%s2518_s4 + $0x68] sm:$0xff] %vm1441_vm1, %v1425_v54  ;;  %v1554_v59 = vmul.f32 -1.442695, %v1195_v55  ;;  %v989_v62 = vpop.f32.mrb[100].mxu1 }
 0x206   :  { %v1755_v60 = vpop.eup %1754  ;;  %v1342_v61 = vadd.f32 1.0, %v1753_v58  ;;  %v1199_v13 = vpop.f32.mrb[100].mxu0 }
 0x207   :  { %v1426_v3 = vmul.f32 16.0, %v1755_v60  ;;  %1764 = vpow2.f32 %v1554_v59  ;;  %v1200_v63 = vadd.f32 %v1199_v13, %v989_v62  ;;  %v991_v0 = vpop.f32.mrb[101].mxu1  ;;  %v1201_v1 = vpop.f32.mrb[101].mxu0 }
 0x208   :  { %1766 = vrcp.f32 %v1342_v61 }
 0x209   :  { %v1757_v14 = vpop.eup %1756  ;;  %1456 = vst.msk [vmem:[%s2518_s4 + $0x70] sm:$0xff] %vm1441_vm1, %v1426_v3  ;;  %v1555_v2 = vmul.f32 -1.442695, %v1200_v63  ;;  %v994_v5 = vpop.f32.mrb[102].mxu1 }
 0x20a   :  { %v1759_v15 = vpop.eup %1758  ;;  %v1343_v4 = vadd.f32 1.0, %v1757_v14  ;;  %v1204_v6 = vpop.f32.mrb[102].mxu0 }
 0x20b   :  { %v1427_v8 = vmul.f32 16.0, %v1759_v15  ;;  %1768 = vpow2.f32 %v1555_v2  ;;  %v1205_v9 = vadd.f32 %v1204_v6, %v994_v5  ;;  %v996_v10 = vpop.f32.mrb[103].mxu1  ;;  %v1206_v11 = vpop.f32.mrb[103].mxu0 }
 0x20c   :  { %1770 = vrcp.f32 %v1343_v4 }
 0x20d   :  { %v1761_v12 = vpop.eup %1760  ;;  %1457 = vst.msk [vmem:[%s2518_s4 + $0x78] sm:$0xff] %vm1441_vm1, %v1427_v8  ;;  %v1556_v16 = vmul.f32 -1.442695, %v1205_v9  ;;  %v999_v19 = vpop.f32.mrb[104].mxu1 }
 0x20e   :  { %v1763_v17 = vpop.eup %1762  ;;  %v1344_v18 = vadd.f32 1.0, %v1761_v12  ;;  %v1209_v20 = vpop.f32.mrb[104].mxu0 }
 0x20f   :  { %v1428_v21 = vmul.f32 16.0, %v1763_v17  ;;  %1772 = vpow2.f32 %v1556_v16  ;;  %v1210_v22 = vadd.f32 %v1209_v20, %v999_v19  ;;  %v1001_v23 = vpop.f32.mrb[105].mxu1  ;;  %v1211_v24 = vpop.f32.mrb[105].mxu0 }
 0x210   :  { %1774 = vrcp.f32 %v1344_v18 }
 0x211   :  { %v1765_v25 = vpop.eup %1764  ;;  %1458 = vst.msk [vmem:[%s2518_s4 + $0x80] sm:$0xff] %vm1441_vm1, %v1428_v21  ;;  %v1557_v26 = vmul.f32 -1.442695, %v1210_v22  ;;  %v1004_v29 = vpop.f32.mrb[106].mxu1 }
 0x212   :  { %v1767_v27 = vpop.eup %1766  ;;  %v1345_v28 = vadd.f32 1.0, %v1765_v25  ;;  %v1214_v30 = vpop.f32.mrb[106].mxu0 }
 0x213   :  { %v1429_v31 = vmul.f32 16.0, %v1767_v27  ;;  %1776 = vpow2.f32 %v1557_v26  ;;  %v1215_v32 = vadd.f32 %v1214_v30, %v1004_v29  ;;  %v1006_v33 = vpop.f32.mrb[107].mxu1  ;;  %v1216_v34 = vpop.f32.mrb[107].mxu0 }
 0x214   :  { %1778 = vrcp.f32 %v1345_v28 }
 0x215   :  { %v1769_v35 = vpop.eup %1768  ;;  %1459 = vst.msk [vmem:[%s2518_s4 + $0x88] sm:$0xff] %vm1441_vm1, %v1429_v31  ;;  %v1558_v36 = vmul.f32 -1.442695, %v1215_v32  ;;  %v1009_v39 = vpop.f32.mrb[108].mxu1 }
 0x216   :  { %v1771_v37 = vpop.eup %1770  ;;  %v1346_v38 = vadd.f32 1.0, %v1769_v35  ;;  %v1219_v40 = vpop.f32.mrb[108].mxu0 }
 0x217   :  { %v1430_v41 = vmul.f32 16.0, %v1771_v37  ;;  %1780 = vpow2.f32 %v1558_v36  ;;  %v1220_v42 = vadd.f32 %v1219_v40, %v1009_v39  ;;  %v1011_v43 = vpop.f32.mrb[109].mxu1  ;;  %v1221_v44 = vpop.f32.mrb[109].mxu0 }
 0x218   :  { %1782 = vrcp.f32 %v1346_v38 }
 0x219   :  { %v1773_v45 = vpop.eup %1772  ;;  %1460 = vst.msk [vmem:[%s2518_s4 + $0x90] sm:$0xff] %vm1441_vm1, %v1430_v41  ;;  %v1559_v46 = vmul.f32 -1.442695, %v1220_v42  ;;  %v1014_v49 = vpop.f32.mrb[110].mxu1 }
 0x21a   :  { %v1775_v47 = vpop.eup %1774  ;;  %v1347_v48 = vadd.f32 1.0, %v1773_v45  ;;  %v1224_v50 = vpop.f32.mrb[110].mxu0 }
 0x21b   :  { %v1431_v51 = vmul.f32 16.0, %v1775_v47  ;;  %1784 = vpow2.f32 %v1559_v46  ;;  %v1225_v52 = vadd.f32 %v1224_v50, %v1014_v49  ;;  %v1016_v53 = vpop.f32.mrb[111].mxu1  ;;  %v1226_v7 = vpop.f32.mrb[111].mxu0 }
 0x21c   :  { %1786 = vrcp.f32 %v1347_v48 }
 0x21d   :  { %v1777_v54 = vpop.eup %1776  ;;  %1461 = vst.msk [vmem:[%s2518_s4 + $0x98] sm:$0xff] %vm1441_vm1, %v1431_v51  ;;  %v1560_v55 = vmul.f32 -1.442695, %v1225_v52  ;;  %v1019_v58 = vpop.f32.mrb[112].mxu1 }
 0x21e   :  { %v1779_v56 = vpop.eup %1778  ;;  %v1348_v57 = vadd.f32 1.0, %v1777_v54  ;;  %v1229_v59 = vpop.f32.mrb[112].mxu0 }
 0x21f   :  { %v1432_v60 = vmul.f32 16.0, %v1779_v56  ;;  %1788 = vpow2.f32 %v1560_v55  ;;  %v1230_v61 = vadd.f32 %v1229_v59, %v1019_v58  ;;  %v1021_v62 = vpop.f32.mrb[113].mxu1  ;;  %v1231_v13 = vpop.f32.mrb[113].mxu0 }
 0x220   :  { %1790 = vrcp.f32 %v1348_v57 }
 0x221   :  { %v1781_v3 = vpop.eup %1780  ;;  %1462 = vst.msk [vmem:[%s2518_s4 + $0xa0] sm:$0xff] %vm1441_vm1, %v1432_v60  ;;  %v1561_v63 = vmul.f32 -1.442695, %v1230_v61  ;;  %v1024_v14 = vpop.f32.mrb[114].mxu1 }
 0x222   :  { %v1783_v0 = vpop.eup %1782  ;;  %v1349_v1 = vadd.f32 1.0, %v1781_v3  ;;  %v1234_v2 = vpop.f32.mrb[114].mxu0 }
 0x223   :  { %v1433_v15 = vmul.f32 16.0, %v1783_v0  ;;  %1792 = vpow2.f32 %v1561_v63  ;;  %v1235_v4 = vadd.f32 %v1234_v2, %v1024_v14  ;;  %v1026_v5 = vpop.f32.mrb[115].mxu1  ;;  %v1236_v6 = vpop.f32.mrb[115].mxu0 }
 0x224   :  { %1794 = vrcp.f32 %v1349_v1 }
 0x225   :  { %v1785_v8 = vpop.eup %1784  ;;  %1463 = vst.msk [vmem:[%s2518_s4 + $0xa8] sm:$0xff] %vm1441_vm1, %v1433_v15  ;;  %v1562_v9 = vmul.f32 -1.442695, %v1235_v4 }
 0x226   :  { %v1787_v10 = vpop.eup %1786  ;;  %v1350_v11 = vadd.f32 1.0, %v1785_v8 }
 0x227   :  { %v1434_v12 = vmul.f32 16.0, %v1787_v10  ;;  %1796 = vpow2.f32 %v1562_v9 }
 0x228   :  { %1798 = vrcp.f32 %v1350_v11 }
 0x229   :  { %v1789_v16 = vpop.eup %1788  ;;  %1464 = vst.msk [vmem:[%s2518_s4 + $0xb0] sm:$0xff] %vm1441_vm1, %v1434_v12 }
 0x22a   :  { %v1791_v17 = vpop.eup %1790  ;;  %v1351_v18 = vadd.f32 1.0, %v1789_v16 }
 0x22b   :  { %v1435_v19 = vmul.f32 16.0, %v1791_v17 }
 0x22c   :  { %1800 = vrcp.f32 %v1351_v18 }
 0x22d   :  { %v1793_v20 = vpop.eup %1792  ;;  %1465 = vst.msk [vmem:[%s2518_s4 + $0xb8] sm:$0xff] %vm1441_vm1, %v1435_v19 }
 0x22e   :  { %v1795_v21 = vpop.eup %1794  ;;  %v1352_v22 = vadd.f32 1.0, %v1793_v20 }
 0x22f   :  { %v1436_v23 = vmul.f32 16.0, %v1795_v21 }
 0x230   :  { %1802 = vrcp.f32 %v1352_v22 }
 0x231   :  { %v1797_v24 = vpop.eup %1796  ;;  %1466 = vst.msk [vmem:[%s2518_s4 + $0xc0] sm:$0xff] %vm1441_vm1, %v1436_v23 }
 0x232   :  { %v1799_v25 = vpop.eup %1798  ;;  %v1353_v26 = vadd.f32 1.0, %v1797_v24 }
 0x233   :  { %v1437_v27 = vmul.f32 16.0, %v1799_v25 }
 0x234   :  { %1804 = vrcp.f32 %v1353_v26 }
 0x235   :  { %1467 = vst.msk [vmem:[%s2518_s4 + $0xc8] sm:$0xff] %vm1441_vm1, %v1437_v27 }
 0x236   :  { %v1801_v28 = vpop.eup %1800 }
 0x237   :  { %v1438_v29 = vmul.f32 16.0, %v1801_v28 }
 0x239   :  { %1468 = vst.msk [vmem:[%s2518_s4 + $0xd0] sm:$0xff] %vm1441_vm1, %v1438_v29 }
 0x23a   :  { %v1803_v30 = vpop.eup %1802 }
 0x23b   :  { %v1439_v31 = vmul.f32 16.0, %v1803_v30 }
 0x23d   :  { %1469 = vst.msk [vmem:[%s2518_s4 + $0xd8] sm:$0xff] %vm1441_vm1, %v1439_v31 }
 0x23e   :  { %v1805_v32 = vpop.eup %1804 }
 0x23f   :  { %v1440_v33 = vmul.f32 16.0, %v1805_v32 }
 0x241   :  { %1471 = vst.msk [vmem:[%s2518_s4 + $0xe0] sm:$0x1] %vm1470_vm2, %v1440_v33 }

</bundles_post_ra>
